<compile_context>
chip_gen: v5e
topology: v5e:2x2
jax: 0.10.0
libtpu: 0.0.40
codegen_flags: <defaults>
</compile_context>

<pallas_src>
import numpy as np
import jax
import jax.numpy as jnp
from jax import lax
from jax.experimental import pallas as pl
from jax.experimental.pallas import tpu as pltpu

_EPSILON = 1e-05


# --------------------------------- fused Pallas kernel ---------------------------------

def _residual_block_kernel(x_ref, s0_ref, b0_ref, w1_ref, s1_ref, b1_ref,
                           wsc_ref, w2_ref, rsc_ref, g1_ref, g2_ref, o_ref):
    """One batch sample per grid step.  Layout: channels x flattened-spatial (lane-dense).

    x_ref [1,Cin,H*W] | s0,b0 [Cin,1] bn0 fold | w1 [9,C1,Cin] conv1 taps
    s1,b1 [C1,1] bn1 fold with conv1 gate folded in | wsc [Csc,Cin] shortcut 1x1
    w2 [9,C2,C1] conv2 taps | rsc [C2,1] output gate (shortcut gate, reused by conv2)
    g1 [9,H*W,M1] / g2 [9,M1,M1] 0/1 tap gather matrices (stride & zero-pad folded in)
    o_ref [1,C2,M1]
    """
    x = x_ref[0]                                                     # [Cin, H*W]
    # bn0 + relu  (weighted_feature with rmask=None is the identity)
    h0 = jnp.maximum(x * s0_ref[...] + b0_ref[...], 0.0)

    c1 = w1_ref.shape[1]
    m1 = g1_ref.shape[2]
    n_taps = w1_ref.shape[0]
    center = n_taps // 2

    # conv1 (3x3, stride 2, pad 1) + shortcut (1x1, stride 2) sharing the centre-tap gather
    acc1 = jnp.zeros((c1, m1), jnp.float32)
    shortcut = None
    for t in range(n_taps):
        v = jnp.dot(h0, g1_ref[t], preferred_element_type=jnp.float32)       # [Cin, M1]
        acc1 = acc1 + jnp.dot(w1_ref[t], v, preferred_element_type=jnp.float32)
        if t == center:  # 1x1 stride-2 shortcut reads exactly conv1's centre-tap slice
            shortcut = jnp.dot(wsc_ref[...], v, preferred_element_type=jnp.float32)

    # bn1 + conv1 channel gate + relu  (gate folded into s1/b1 on the host; exact)
    h1 = jnp.maximum(acc1 * s1_ref[...] + b1_ref[...], 0.0)                  # [C1, M1]

    # conv2 (3x3, stride 1, pad 1) with the residual add fused into the accumulator
    acc2 = shortcut
    for t in range(n_taps):
        v2 = jnp.dot(h1, g2_ref[t], preferred_element_type=jnp.float32)      # [C1, M1]
        acc2 = acc2 + jnp.dot(w2_ref[t], v2, preferred_element_type=jnp.float32)

    # x = weighted_feature(conv2_out + shortcut, rmask_shortcut)
    o_ref[0] = acc2 * rsc_ref[...]


# ------------------------------------ glue helpers -------------------------------------

def _conv_gather_mats(h, w, kh, kw, stride, pad):
    """0/1 selection matrices G[t, h*w, ho*wo]: column (ho,wo) of tap t picks the input
    pixel that tap reads (zero column where the tap reads zero padding)."""
    ho = (h + 2 * pad - kh) // stride + 1
    wo = (w + 2 * pad - kw) // stride + 1
    rows, cols = np.arange(h), np.arange(w)
    orow, ocol = np.arange(ho), np.arange(wo)
    mats = np.zeros((kh * kw, h * w, ho * wo), dtype=np.float32)
    for i in range(kh):
        for j in range(kw):
            mh = (rows[:, None] == (stride * orow[None, :] + i - pad)).astype(np.float32)
            mw = (cols[:, None] == (stride * ocol[None, :] + j - pad)).astype(np.float32)
            mats[i * kw + j] = (mh[:, None, :, None] * mw[None, :, None, :]).reshape(h * w, ho * wo)
    return mats, ho, wo


def _gate_prob_rmask(logits, tau):
    # TODO(synk): deterministic model of the DNAS Gumbel gate (noise-free softmax + reverse cumsum).
    prob = jax.nn.softmax(logits / tau)
    rmask = jnp.cumsum(prob[::-1])[::-1]
    return prob, rmask


def _expected_flops(kh, kw, ho, wo, p_in, cin, rmask_out):
    e_in = jnp.asarray(float(cin)) if p_in is None else jnp.sum(jnp.cumsum(p_in[::-1])[::-1])
    return 2.0 * kh * kw * e_in * jnp.sum(rmask_out) * ho * wo


# --------------------------------------- forward ---------------------------------------

def residual_block_gated_forward(x_nchw, params, tau=1.0):
    """ResidualBlockGated.forward with project=True (conv shortcut), stride=2, tau=1,
    noise=False, reuse_prob=None, rmask=None.  Returns (x, rmask_2, prob, prob_list, flops_list)."""
    N, Cin, H, W = x_nchw.shape
    w1, w2, w_sc = params["w1"], params["w2"], params["w_sc"]
    C1, C2, Csc = w1.shape[0], w2.shape[0], w_sc.shape[0]
    assert C2 == Csc, "conv2 reuses the shortcut's channel gate, so c2 must equal c_shortcut"

    # channel gates (deterministic model; conv2 reuses the shortcut gate via dcfg.reuse_gate)
    p_sc, rmask_sc = _gate_prob_rmask(params["gate_sc"], tau)
    p1, rmask_1 = _gate_prob_rmask(params["gate_1"], tau)
    p2, rmask_2 = _gate_prob_rmask(params["gate_sc"], tau)

    # BN affine folds (exact): bn(x) = x*scale + bias
    g0, b0, m0, v0 = params["bn0"]
    scale0 = g0 / jnp.sqrt(v0 + _EPSILON)
    bias0 = b0 - m0 * scale0
    g1b, b1b, m1b, v1b = params["bn1"]
    scale1 = g1b / jnp.sqrt(v1b + _EPSILON)
    bias1 = b1b - m1b * scale1
    s1g = scale1 * rmask_1            # fold conv1 gate into the bn1 epilogue (exact)
    b1g = bias1 * rmask_1

    # per-tap weight matrices [kh*kw, Cout, Cin]
    w1_t = jnp.transpose(w1, (2, 3, 0, 1)).reshape(9, C1, Cin).astype(jnp.float32)
    w2_t = jnp.transpose(w2, (2, 3, 0, 1)).reshape(9, C2, C1).astype(jnp.float32)
    wsc_m = w_sc[:, :, 0, 0].astype(jnp.float32)

    # static 0/1 gather matrices (in-kernel patch extraction; stride & zero-pad folded in)
    g1_np, Ho1, Wo1 = _conv_gather_mats(H, W, 3, 3, 2, 1)
    g2_np, Ho2, Wo2 = _conv_gather_mats(Ho1, Wo1, 3, 3, 1, 1)
    M1, M2 = Ho1 * Wo1, Ho2 * Wo2

    x2d = x_nchw.reshape(N, Cin, H * W).astype(jnp.float32)   # pure reshape, stays NCHW-major

    out_flat = pl.pallas_call(
        _residual_block_kernel,
        out_shape=jax.ShapeDtypeStruct((N, C2, M2), jnp.float32),
        grid=(N,),
        in_specs=[
            pl.BlockSpec((1, Cin, H * W), lambda n: (n, 0, 0)),
            pl.BlockSpec((Cin, 1), lambda n: (0, 0)),
            pl.BlockSpec((Cin, 1), lambda n: (0, 0)),
            pl.BlockSpec((9, C1, Cin), lambda n: (0, 0, 0)),
            pl.BlockSpec((C1, 1), lambda n: (0, 0)),
            pl.BlockSpec((C1, 1), lambda n: (0, 0)),
            pl.BlockSpec((Csc, Cin), lambda n: (0, 0)),
            pl.BlockSpec((9, C2, C1), lambda n: (0, 0, 0)),
            pl.BlockSpec((C2, 1), lambda n: (0, 0)),
            pl.BlockSpec((9, H * W, M1), lambda n: (0, 0, 0)),
            pl.BlockSpec((9, M1, M2), lambda n: (0, 0, 0)),
        ],
        out_specs=pl.BlockSpec((1, C2, M2), lambda n: (n, 0, 0)),
        compiler_params=pltpu.CompilerParams(dimension_semantics=("parallel",)),
    )(
        x2d,
        scale0.reshape(Cin, 1), bias0.reshape(Cin, 1),
        w1_t, s1g.reshape(C1, 1), b1g.reshape(C1, 1),
        wsc_m, w2_t, rmask_sc.reshape(C2, 1),
        jnp.asarray(g1_np), jnp.asarray(g2_np),
    )
    out = out_flat.reshape(N, C2, Ho2, Wo2)                   # already NCHW, no transpose

    # expected-FLOPs bookkeeping (modelled DNAS; matches the module's p_in threading)
    flops_sc = _expected_flops(1, 1, Ho1, Wo1, None, Cin, rmask_sc)
    flops_1 = _expected_flops(3, 3, Ho1, Wo1, p_sc, Cin, rmask_1)
    flops_2 = _expected_flops(3, 3, Ho2, Wo2, p1, C1, rmask_2)

    prob_list = [p1, p2, p_sc]
    flops_list = [flops_1, flops_2, flops_sc]
    return out, rmask_2, p2, prob_list, flops_list


# ----------------------------------- pure-JAX reference ---------------------------------

def _ref_forward(x_nchw, params, tau=1.0):
    def bn(x, g, b, m, v):
        return ((x - m[None, :, None, None]) / jnp.sqrt(v[None, :, None, None] + _EPSILON)
                * g[None, :, None, None] + b[None, :, None, None])

    p_sc, rmask_sc = _gate_prob_rmask(params["gate_sc"], tau)
    _, rmask_1 = _gate_prob_rmask(params["gate_1"], tau)

    dn = ("NCHW", "OIHW", "NCHW")
    h0 = jax.nn.relu(bn(x_nchw, *params["bn0"]))
    sc = lax.conv_general_dilated(h0, params["w_sc"], (2, 2), ((0, 0), (0, 0)), dimension_numbers=dn)
    c1 = lax.conv_general_dilated(h0, params["w1"], (2, 2), ((1, 1), (1, 1)), dimension_numbers=dn)
    h1 = jax.nn.relu(bn(c1, *params["bn1"]) * rmask_1[None, :, None, None])
    c2 = lax.conv_general_dilated(h1, params["w2"], (1, 1), ((1, 1), (1, 1)), dimension_numbers=dn)
    return (c2 + sc) * rmask_sc[None, :, None, None]


# ------------------------------------------ main ----------------------------------------

if __name__ == "__main__":
    # Module config: in_planes=4, out_planes_list=[8, 8, 8], stride=2, project=True
    N, Cin, H, W = 2, 4, 16, 16
    C1, C2, Csc = 8, 8, 8

    key = jax.random.PRNGKey(0)
    ks = jax.random.split(key, 12)

    params = {
        "bn0": (jax.random.uniform(ks[0], (Cin,), minval=0.5, maxval=1.5),
                0.1 * jax.random.normal(ks[1], (Cin,)),
                0.1 * jax.random.normal(ks[2], (Cin,)),
                jax.random.uniform(ks[3], (Cin,), minval=0.5, maxval=1.5)),
        "bn1": (jax.random.uniform(ks[4], (C1,), minval=0.5, maxval=1.5),
                0.1 * jax.random.normal(ks[5], (C1,)),
                0.1 * jax.random.normal(ks[6], (C1,)),
                jax.random.uniform(ks[7], (C1,), minval=0.5, maxval=1.5)),
        "w1": 0.2 * jax.random.normal(ks[8], (C1, Cin, 3, 3), dtype=jnp.float32),
        "w2": 0.2 * jax.random.normal(ks[9], (C2, C1, 3, 3), dtype=jnp.float32),
        "w_sc": 0.2 * jax.random.normal(ks[10], (Csc, Cin, 1, 1), dtype=jnp.float32),
        "gate_1": jax.random.normal(ks[11], (C1,), dtype=jnp.float32),
        "gate_sc": jax.random.normal(jax.random.fold_in(key, 99), (Csc,), dtype=jnp.float32),
    }

    x = jax.random.normal(jax.random.fold_in(key, 7), (N, Cin, H, W), dtype=jnp.float32)

    out, rmask_2, prob, prob_list, flops_list = residual_block_gated_forward(x, params, tau=1.0)
    out = jax.block_until_ready(out)

    ref = jax.block_until_ready(_ref_forward(x, params, tau=1.0))
    assert out.shape == (N, Csc, H // 2, W // 2), out.shape
    assert jnp.allclose(out, ref, atol=2e-4, rtol=2e-4), float(jnp.max(jnp.abs(out - ref)))

    print("KERNEL_OK")
</pallas_src>

<mosaic_0001>
module attributes {stable_mosaic.version = 11 : i64} {
  func.func @_residual_block_kernel(%arg0: i32, %arg1: memref<1x4x256xf32, #tpu.memory_space<vmem>>, %arg2: memref<4x1xf32, #tpu.memory_space<vmem>>, %arg3: memref<4x1xf32, #tpu.memory_space<vmem>>, %arg4: memref<9x8x4xf32, #tpu.memory_space<vmem>>, %arg5: memref<8x1xf32, #tpu.memory_space<vmem>>, %arg6: memref<8x1xf32, #tpu.memory_space<vmem>>, %arg7: memref<8x4xf32, #tpu.memory_space<vmem>>, %arg8: memref<9x8x8xf32, #tpu.memory_space<vmem>>, %arg9: memref<8x1xf32, #tpu.memory_space<vmem>>, %arg10: memref<9x256x64xf32, #tpu.memory_space<vmem>>, %arg11: memref<9x64x64xf32, #tpu.memory_space<vmem>>, %arg12: memref<1x8x64xf32, #tpu.memory_space<vmem>>) attributes {dimension_semantics = [#tpu.dimension_semantics<parallel>], iteration_bounds = array<i64: 2>, scalar_prefetch = 0 : i64, scratch_operands = 0 : i64, tpu.core_type = #tpu.core_type<tc>, window_params = [{transform_indices = @transform_0, window_bounds = array<i64: 1, 4, 256>}, {pipeline_mode = #tpu.pipeline_mode<synchronous>, transform_indices = @transform_1, window_bounds = array<i64: 4, 1>}, {pipeline_mode = #tpu.pipeline_mode<synchronous>, transform_indices = @transform_2, window_bounds = array<i64: 4, 1>}, {pipeline_mode = #tpu.pipeline_mode<synchronous>, transform_indices = @transform_3, window_bounds = array<i64: 9, 8, 4>}, {pipeline_mode = #tpu.pipeline_mode<synchronous>, transform_indices = @transform_4, window_bounds = array<i64: 8, 1>}, {pipeline_mode = #tpu.pipeline_mode<synchronous>, transform_indices = @transform_5, window_bounds = array<i64: 8, 1>}, {pipeline_mode = #tpu.pipeline_mode<synchronous>, transform_indices = @transform_6, window_bounds = array<i64: 8, 4>}, {pipeline_mode = #tpu.pipeline_mode<synchronous>, transform_indices = @transform_7, window_bounds = array<i64: 9, 8, 8>}, {pipeline_mode = #tpu.pipeline_mode<synchronous>, transform_indices = @transform_8, window_bounds = array<i64: 8, 1>}, {pipeline_mode = #tpu.pipeline_mode<synchronous>, transform_indices = @transform_9, window_bounds = array<i64: 9, 256, 64>}, {pipeline_mode = #tpu.pipeline_mode<synchronous>, transform_indices = @transform_10, window_bounds = array<i64: 9, 64, 64>}, {transform_indices = @transform_11, window_bounds = array<i64: 1, 8, 64>}]} {
    %c0 = arith.constant 0 : index
    %c0_0 = arith.constant 0 : index
    %c0_1 = arith.constant 0 : index
    %0 = vector.load %arg1[%c0, %c0_0, %c0_1] : memref<1x4x256xf32, #tpu.memory_space<vmem>>, vector<1x4x256xf32>
    %1 = vector.shape_cast %0 : vector<1x4x256xf32> to vector<4x256xf32>
    %c0_2 = arith.constant 0 : index
    %c0_3 = arith.constant 0 : index
    %2 = vector.load %arg2[%c0_2, %c0_3] : memref<4x1xf32, #tpu.memory_space<vmem>>, vector<4x1xf32>
    %3 = vector.broadcast %2 : vector<4x1xf32> to vector<4x256xf32>
    %4 = arith.mulf %1, %3 : vector<4x256xf32>
    %c0_4 = arith.constant 0 : index
    %c0_5 = arith.constant 0 : index
    %5 = vector.load %arg3[%c0_4, %c0_5] : memref<4x1xf32, #tpu.memory_space<vmem>>, vector<4x1xf32>
    %6 = vector.broadcast %5 : vector<4x1xf32> to vector<4x256xf32>
    %7 = arith.addf %4, %6 : vector<4x256xf32>
    %cst = arith.constant 0.000000e+00 : f32
    %8 = vector.broadcast %cst : f32 to vector<4x256xf32>
    %9 = arith.maximumf %7, %8 : vector<4x256xf32>
    %cst_6 = arith.constant 0.000000e+00 : f32
    %10 = vector.broadcast %cst_6 : f32 to vector<8x64xf32>
    %c0_7 = arith.constant 0 : index
    %c0_8 = arith.constant 0 : index
    %c0_9 = arith.constant 0 : index
    %11 = vector.load %arg10[%c0_7, %c0_8, %c0_9] : memref<9x256x64xf32, #tpu.memory_space<vmem>>, vector<1x256x64xf32>
    %12 = vector.shape_cast %11 : vector<1x256x64xf32> to vector<256x64xf32>
    %cst_10 = arith.constant dense<0.000000e+00> : vector<4x64xf32>
    %13 = tpu.matmul %9, %12, %cst_10 {dimension_numbers = #tpu.dot_dimension_numbers<[1], [0], [0], [1], [0, 0, 1, 1], [], []>} : vector<4x256xf32>, vector<256x64xf32>, vector<4x64xf32> -> vector<4x64xf32>
    %c0_11 = arith.constant 0 : index
    %c0_12 = arith.constant 0 : index
    %c0_13 = arith.constant 0 : index
    %14 = vector.load %arg4[%c0_11, %c0_12, %c0_13] : memref<9x8x4xf32, #tpu.memory_space<vmem>>, vector<1x8x4xf32>
    %15 = vector.shape_cast %14 : vector<1x8x4xf32> to vector<8x4xf32>
    %cst_14 = arith.constant dense<0.000000e+00> : vector<8x64xf32>
    %16 = tpu.matmul %15, %13, %cst_14 {dimension_numbers = #tpu.dot_dimension_numbers<[1], [0], [0], [1], [0, 0, 1, 1], [], []>} : vector<8x4xf32>, vector<4x64xf32>, vector<8x64xf32> -> vector<8x64xf32>
    %17 = arith.addf %10, %16 : vector<8x64xf32>
    %c1 = arith.constant 1 : index
    %c0_15 = arith.constant 0 : index
    %c0_16 = arith.constant 0 : index
    %18 = vector.load %arg10[%c1, %c0_15, %c0_16] : memref<9x256x64xf32, #tpu.memory_space<vmem>>, vector<1x256x64xf32>
    %19 = vector.shape_cast %18 : vector<1x256x64xf32> to vector<256x64xf32>
    %cst_17 = arith.constant dense<0.000000e+00> : vector<4x64xf32>
    %20 = tpu.matmul %9, %19, %cst_17 {dimension_numbers = #tpu.dot_dimension_numbers<[1], [0], [0], [1], [0, 0, 1, 1], [], []>} : vector<4x256xf32>, vector<256x64xf32>, vector<4x64xf32> -> vector<4x64xf32>
    %c1_18 = arith.constant 1 : index
    %c0_19 = arith.constant 0 : index
    %c0_20 = arith.constant 0 : index
    %21 = vector.load %arg4[%c1_18, %c0_19, %c0_20] : memref<9x8x4xf32, #tpu.memory_space<vmem>>, vector<1x8x4xf32>
    %22 = vector.shape_cast %21 : vector<1x8x4xf32> to vector<8x4xf32>
    %cst_21 = arith.constant dense<0.000000e+00> : vector<8x64xf32>
    %23 = tpu.matmul %22, %20, %cst_21 {dimension_numbers = #tpu.dot_dimension_numbers<[1], [0], [0], [1], [0, 0, 1, 1], [], []>} : vector<8x4xf32>, vector<4x64xf32>, vector<8x64xf32> -> vector<8x64xf32>
    %24 = arith.addf %17, %23 : vector<8x64xf32>
    %c2 = arith.constant 2 : index
    %c0_22 = arith.constant 0 : index
    %c0_23 = arith.constant 0 : index
    %25 = vector.load %arg10[%c2, %c0_22, %c0_23] : memref<9x256x64xf32, #tpu.memory_space<vmem>>, vector<1x256x64xf32>
    %26 = vector.shape_cast %25 : vector<1x256x64xf32> to vector<256x64xf32>
    %cst_24 = arith.constant dense<0.000000e+00> : vector<4x64xf32>
    %27 = tpu.matmul %9, %26, %cst_24 {dimension_numbers = #tpu.dot_dimension_numbers<[1], [0], [0], [1], [0, 0, 1, 1], [], []>} : vector<4x256xf32>, vector<256x64xf32>, vector<4x64xf32> -> vector<4x64xf32>
    %c2_25 = arith.constant 2 : index
    %c0_26 = arith.constant 0 : index
    %c0_27 = arith.constant 0 : index
    %28 = vector.load %arg4[%c2_25, %c0_26, %c0_27] : memref<9x8x4xf32, #tpu.memory_space<vmem>>, vector<1x8x4xf32>
    %29 = vector.shape_cast %28 : vector<1x8x4xf32> to vector<8x4xf32>
    %cst_28 = arith.constant dense<0.000000e+00> : vector<8x64xf32>
    %30 = tpu.matmul %29, %27, %cst_28 {dimension_numbers = #tpu.dot_dimension_numbers<[1], [0], [0], [1], [0, 0, 1, 1], [], []>} : vector<8x4xf32>, vector<4x64xf32>, vector<8x64xf32> -> vector<8x64xf32>
    %31 = arith.addf %24, %30 : vector<8x64xf32>
    %c3 = arith.constant 3 : index
    %c0_29 = arith.constant 0 : index
    %c0_30 = arith.constant 0 : index
    %32 = vector.load %arg10[%c3, %c0_29, %c0_30] : memref<9x256x64xf32, #tpu.memory_space<vmem>>, vector<1x256x64xf32>
    %33 = vector.shape_cast %32 : vector<1x256x64xf32> to vector<256x64xf32>
    %cst_31 = arith.constant dense<0.000000e+00> : vector<4x64xf32>
    %34 = tpu.matmul %9, %33, %cst_31 {dimension_numbers = #tpu.dot_dimension_numbers<[1], [0], [0], [1], [0, 0, 1, 1], [], []>} : vector<4x256xf32>, vector<256x64xf32>, vector<4x64xf32> -> vector<4x64xf32>
    %c3_32 = arith.constant 3 : index
    %c0_33 = arith.constant 0 : index
    %c0_34 = arith.constant 0 : index
    %35 = vector.load %arg4[%c3_32, %c0_33, %c0_34] : memref<9x8x4xf32, #tpu.memory_space<vmem>>, vector<1x8x4xf32>
    %36 = vector.shape_cast %35 : vector<1x8x4xf32> to vector<8x4xf32>
    %cst_35 = arith.constant dense<0.000000e+00> : vector<8x64xf32>
    %37 = tpu.matmul %36, %34, %cst_35 {dimension_numbers = #tpu.dot_dimension_numbers<[1], [0], [0], [1], [0, 0, 1, 1], [], []>} : vector<8x4xf32>, vector<4x64xf32>, vector<8x64xf32> -> vector<8x64xf32>
    %38 = arith.addf %31, %37 : vector<8x64xf32>
    %c4 = arith.constant 4 : index
    %c0_36 = arith.constant 0 : index
    %c0_37 = arith.constant 0 : index
    %39 = vector.load %arg10[%c4, %c0_36, %c0_37] : memref<9x256x64xf32, #tpu.memory_space<vmem>>, vector<1x256x64xf32>
    %40 = vector.shape_cast %39 : vector<1x256x64xf32> to vector<256x64xf32>
    %cst_38 = arith.constant dense<0.000000e+00> : vector<4x64xf32>
    %41 = tpu.matmul %9, %40, %cst_38 {dimension_numbers = #tpu.dot_dimension_numbers<[1], [0], [0], [1], [0, 0, 1, 1], [], []>} : vector<4x256xf32>, vector<256x64xf32>, vector<4x64xf32> -> vector<4x64xf32>
    %c4_39 = arith.constant 4 : index
    %c0_40 = arith.constant 0 : index
    %c0_41 = arith.constant 0 : index
    %42 = vector.load %arg4[%c4_39, %c0_40, %c0_41] : memref<9x8x4xf32, #tpu.memory_space<vmem>>, vector<1x8x4xf32>
    %43 = vector.shape_cast %42 : vector<1x8x4xf32> to vector<8x4xf32>
    %cst_42 = arith.constant dense<0.000000e+00> : vector<8x64xf32>
    %44 = tpu.matmul %43, %41, %cst_42 {dimension_numbers = #tpu.dot_dimension_numbers<[1], [0], [0], [1], [0, 0, 1, 1], [], []>} : vector<8x4xf32>, vector<4x64xf32>, vector<8x64xf32> -> vector<8x64xf32>
    %45 = arith.addf %38, %44 : vector<8x64xf32>
    %c0_43 = arith.constant 0 : index
    %c0_44 = arith.constant 0 : index
    %46 = vector.load %arg7[%c0_43, %c0_44] : memref<8x4xf32, #tpu.memory_space<vmem>>, vector<8x4xf32>
    %cst_45 = arith.constant dense<0.000000e+00> : vector<8x64xf32>
    %47 = tpu.matmul %46, %41, %cst_45 {dimension_numbers = #tpu.dot_dimension_numbers<[1], [0], [0], [1], [0, 0, 1, 1], [], []>} : vector<8x4xf32>, vector<4x64xf32>, vector<8x64xf32> -> vector<8x64xf32>
    %c5 = arith.constant 5 : index
    %c0_46 = arith.constant 0 : index
    %c0_47 = arith.constant 0 : index
    %48 = vector.load %arg10[%c5, %c0_46, %c0_47] : memref<9x256x64xf32, #tpu.memory_space<vmem>>, vector<1x256x64xf32>
    %49 = vector.shape_cast %48 : vector<1x256x64xf32> to vector<256x64xf32>
    %cst_48 = arith.constant dense<0.000000e+00> : vector<4x64xf32>
    %50 = tpu.matmul %9, %49, %cst_48 {dimension_numbers = #tpu.dot_dimension_numbers<[1], [0], [0], [1], [0, 0, 1, 1], [], []>} : vector<4x256xf32>, vector<256x64xf32>, vector<4x64xf32> -> vector<4x64xf32>
    %c5_49 = arith.constant 5 : index
    %c0_50 = arith.constant 0 : index
    %c0_51 = arith.constant 0 : index
    %51 = vector.load %arg4[%c5_49, %c0_50, %c0_51] : memref<9x8x4xf32, #tpu.memory_space<vmem>>, vector<1x8x4xf32>
    %52 = vector.shape_cast %51 : vector<1x8x4xf32> to vector<8x4xf32>
    %cst_52 = arith.constant dense<0.000000e+00> : vector<8x64xf32>
    %53 = tpu.matmul %52, %50, %cst_52 {dimension_numbers = #tpu.dot_dimension_numbers<[1], [0], [0], [1], [0, 0, 1, 1], [], []>} : vector<8x4xf32>, vector<4x64xf32>, vector<8x64xf32> -> vector<8x64xf32>
    %54 = arith.addf %45, %53 : vector<8x64xf32>
    %c6 = arith.constant 6 : index
    %c0_53 = arith.constant 0 : index
    %c0_54 = arith.constant 0 : index
    %55 = vector.load %arg10[%c6, %c0_53, %c0_54] : memref<9x256x64xf32, #tpu.memory_space<vmem>>, vector<1x256x64xf32>
    %56 = vector.shape_cast %55 : vector<1x256x64xf32> to vector<256x64xf32>
    %cst_55 = arith.constant dense<0.000000e+00> : vector<4x64xf32>
    %57 = tpu.matmul %9, %56, %cst_55 {dimension_numbers = #tpu.dot_dimension_numbers<[1], [0], [0], [1], [0, 0, 1, 1], [], []>} : vector<4x256xf32>, vector<256x64xf32>, vector<4x64xf32> -> vector<4x64xf32>
    %c6_56 = arith.constant 6 : index
    %c0_57 = arith.constant 0 : index
    %c0_58 = arith.constant 0 : index
    %58 = vector.load %arg4[%c6_56, %c0_57, %c0_58] : memref<9x8x4xf32, #tpu.memory_space<vmem>>, vector<1x8x4xf32>
    %59 = vector.shape_cast %58 : vector<1x8x4xf32> to vector<8x4xf32>
    %cst_59 = arith.constant dense<0.000000e+00> : vector<8x64xf32>
    %60 = tpu.matmul %59, %57, %cst_59 {dimension_numbers = #tpu.dot_dimension_numbers<[1], [0], [0], [1], [0, 0, 1, 1], [], []>} : vector<8x4xf32>, vector<4x64xf32>, vector<8x64xf32> -> vector<8x64xf32>
    %61 = arith.addf %54, %60 : vector<8x64xf32>
    %c7 = arith.constant 7 : index
    %c0_60 = arith.constant 0 : index
    %c0_61 = arith.constant 0 : index
    %62 = vector.load %arg10[%c7, %c0_60, %c0_61] : memref<9x256x64xf32, #tpu.memory_space<vmem>>, vector<1x256x64xf32>
    %63 = vector.shape_cast %62 : vector<1x256x64xf32> to vector<256x64xf32>
    %cst_62 = arith.constant dense<0.000000e+00> : vector<4x64xf32>
    %64 = tpu.matmul %9, %63, %cst_62 {dimension_numbers = #tpu.dot_dimension_numbers<[1], [0], [0], [1], [0, 0, 1, 1], [], []>} : vector<4x256xf32>, vector<256x64xf32>, vector<4x64xf32> -> vector<4x64xf32>
    %c7_63 = arith.constant 7 : index
    %c0_64 = arith.constant 0 : index
    %c0_65 = arith.constant 0 : index
    %65 = vector.load %arg4[%c7_63, %c0_64, %c0_65] : memref<9x8x4xf32, #tpu.memory_space<vmem>>, vector<1x8x4xf32>
    %66 = vector.shape_cast %65 : vector<1x8x4xf32> to vector<8x4xf32>
    %cst_66 = arith.constant dense<0.000000e+00> : vector<8x64xf32>
    %67 = tpu.matmul %66, %64, %cst_66 {dimension_numbers = #tpu.dot_dimension_numbers<[1], [0], [0], [1], [0, 0, 1, 1], [], []>} : vector<8x4xf32>, vector<4x64xf32>, vector<8x64xf32> -> vector<8x64xf32>
    %68 = arith.addf %61, %67 : vector<8x64xf32>
    %c8 = arith.constant 8 : index
    %c0_67 = arith.constant 0 : index
    %c0_68 = arith.constant 0 : index
    %69 = vector.load %arg10[%c8, %c0_67, %c0_68] : memref<9x256x64xf32, #tpu.memory_space<vmem>>, vector<1x256x64xf32>
    %70 = vector.shape_cast %69 : vector<1x256x64xf32> to vector<256x64xf32>
    %cst_69 = arith.constant dense<0.000000e+00> : vector<4x64xf32>
    %71 = tpu.matmul %9, %70, %cst_69 {dimension_numbers = #tpu.dot_dimension_numbers<[1], [0], [0], [1], [0, 0, 1, 1], [], []>} : vector<4x256xf32>, vector<256x64xf32>, vector<4x64xf32> -> vector<4x64xf32>
    %c8_70 = arith.constant 8 : index
    %c0_71 = arith.constant 0 : index
    %c0_72 = arith.constant 0 : index
    %72 = vector.load %arg4[%c8_70, %c0_71, %c0_72] : memref<9x8x4xf32, #tpu.memory_space<vmem>>, vector<1x8x4xf32>
    %73 = vector.shape_cast %72 : vector<1x8x4xf32> to vector<8x4xf32>
    %cst_73 = arith.constant dense<0.000000e+00> : vector<8x64xf32>
    %74 = tpu.matmul %73, %71, %cst_73 {dimension_numbers = #tpu.dot_dimension_numbers<[1], [0], [0], [1], [0, 0, 1, 1], [], []>} : vector<8x4xf32>, vector<4x64xf32>, vector<8x64xf32> -> vector<8x64xf32>
    %75 = arith.addf %68, %74 : vector<8x64xf32>
    %c0_74 = arith.constant 0 : index
    %c0_75 = arith.constant 0 : index
    %76 = vector.load %arg5[%c0_74, %c0_75] : memref<8x1xf32, #tpu.memory_space<vmem>>, vector<8x1xf32>
    %77 = vector.broadcast %76 : vector<8x1xf32> to vector<8x64xf32>
    %78 = arith.mulf %75, %77 : vector<8x64xf32>
    %c0_76 = arith.constant 0 : index
    %c0_77 = arith.constant 0 : index
    %79 = vector.load %arg6[%c0_76, %c0_77] : memref<8x1xf32, #tpu.memory_space<vmem>>, vector<8x1xf32>
    %80 = vector.broadcast %79 : vector<8x1xf32> to vector<8x64xf32>
    %81 = arith.addf %78, %80 : vector<8x64xf32>
    %cst_78 = arith.constant 0.000000e+00 : f32
    %82 = vector.broadcast %cst_78 : f32 to vector<8x64xf32>
    %83 = arith.maximumf %81, %82 : vector<8x64xf32>
    %c0_79 = arith.constant 0 : index
    %c0_80 = arith.constant 0 : index
    %c0_81 = arith.constant 0 : index
    %84 = vector.load %arg11[%c0_79, %c0_80, %c0_81] : memref<9x64x64xf32, #tpu.memory_space<vmem>>, vector<1x64x64xf32>
    %85 = vector.shape_cast %84 : vector<1x64x64xf32> to vector<64x64xf32>
    %cst_82 = arith.constant dense<0.000000e+00> : vector<8x64xf32>
    %86 = tpu.matmul %83, %85, %cst_82 {dimension_numbers = #tpu.dot_dimension_numbers<[1], [0], [0], [1], [0, 0, 1, 1], [], []>} : vector<8x64xf32>, vector<64x64xf32>, vector<8x64xf32> -> vector<8x64xf32>
    %c0_83 = arith.constant 0 : index
    %c0_84 = arith.constant 0 : index
    %c0_85 = arith.constant 0 : index
    %87 = vector.load %arg8[%c0_83, %c0_84, %c0_85] : memref<9x8x8xf32, #tpu.memory_space<vmem>>, vector<1x8x8xf32>
    %88 = vector.shape_cast %87 : vector<1x8x8xf32> to vector<8x8xf32>
    %cst_86 = arith.constant dense<0.000000e+00> : vector<8x64xf32>
    %89 = tpu.matmul %88, %86, %cst_86 {dimension_numbers = #tpu.dot_dimension_numbers<[1], [0], [0], [1], [0, 0, 1, 1], [], []>} : vector<8x8xf32>, vector<8x64xf32>, vector<8x64xf32> -> vector<8x64xf32>
    %90 = arith.addf %47, %89 : vector<8x64xf32>
    %c1_87 = arith.constant 1 : index
    %c0_88 = arith.constant 0 : index
    %c0_89 = arith.constant 0 : index
    %91 = vector.load %arg11[%c1_87, %c0_88, %c0_89] : memref<9x64x64xf32, #tpu.memory_space<vmem>>, vector<1x64x64xf32>
    %92 = vector.shape_cast %91 : vector<1x64x64xf32> to vector<64x64xf32>
    %cst_90 = arith.constant dense<0.000000e+00> : vector<8x64xf32>
    %93 = tpu.matmul %83, %92, %cst_90 {dimension_numbers = #tpu.dot_dimension_numbers<[1], [0], [0], [1], [0, 0, 1, 1], [], []>} : vector<8x64xf32>, vector<64x64xf32>, vector<8x64xf32> -> vector<8x64xf32>
    %c1_91 = arith.constant 1 : index
    %c0_92 = arith.constant 0 : index
    %c0_93 = arith.constant 0 : index
    %94 = vector.load %arg8[%c1_91, %c0_92, %c0_93] : memref<9x8x8xf32, #tpu.memory_space<vmem>>, vector<1x8x8xf32>
    %95 = vector.shape_cast %94 : vector<1x8x8xf32> to vector<8x8xf32>
    %cst_94 = arith.constant dense<0.000000e+00> : vector<8x64xf32>
    %96 = tpu.matmul %95, %93, %cst_94 {dimension_numbers = #tpu.dot_dimension_numbers<[1], [0], [0], [1], [0, 0, 1, 1], [], []>} : vector<8x8xf32>, vector<8x64xf32>, vector<8x64xf32> -> vector<8x64xf32>
    %97 = arith.addf %90, %96 : vector<8x64xf32>
    %c2_95 = arith.constant 2 : index
    %c0_96 = arith.constant 0 : index
    %c0_97 = arith.constant 0 : index
    %98 = vector.load %arg11[%c2_95, %c0_96, %c0_97] : memref<9x64x64xf32, #tpu.memory_space<vmem>>, vector<1x64x64xf32>
    %99 = vector.shape_cast %98 : vector<1x64x64xf32> to vector<64x64xf32>
    %cst_98 = arith.constant dense<0.000000e+00> : vector<8x64xf32>
    %100 = tpu.matmul %83, %99, %cst_98 {dimension_numbers = #tpu.dot_dimension_numbers<[1], [0], [0], [1], [0, 0, 1, 1], [], []>} : vector<8x64xf32>, vector<64x64xf32>, vector<8x64xf32> -> vector<8x64xf32>
    %c2_99 = arith.constant 2 : index
    %c0_100 = arith.constant 0 : index
    %c0_101 = arith.constant 0 : index
    %101 = vector.load %arg8[%c2_99, %c0_100, %c0_101] : memref<9x8x8xf32, #tpu.memory_space<vmem>>, vector<1x8x8xf32>
    %102 = vector.shape_cast %101 : vector<1x8x8xf32> to vector<8x8xf32>
    %cst_102 = arith.constant dense<0.000000e+00> : vector<8x64xf32>
    %103 = tpu.matmul %102, %100, %cst_102 {dimension_numbers = #tpu.dot_dimension_numbers<[1], [0], [0], [1], [0, 0, 1, 1], [], []>} : vector<8x8xf32>, vector<8x64xf32>, vector<8x64xf32> -> vector<8x64xf32>
    %104 = arith.addf %97, %103 : vector<8x64xf32>
    %c3_103 = arith.constant 3 : index
    %c0_104 = arith.constant 0 : index
    %c0_105 = arith.constant 0 : index
    %105 = vector.load %arg11[%c3_103, %c0_104, %c0_105] : memref<9x64x64xf32, #tpu.memory_space<vmem>>, vector<1x64x64xf32>
    %106 = vector.shape_cast %105 : vector<1x64x64xf32> to vector<64x64xf32>
    %cst_106 = arith.constant dense<0.000000e+00> : vector<8x64xf32>
    %107 = tpu.matmul %83, %106, %cst_106 {dimension_numbers = #tpu.dot_dimension_numbers<[1], [0], [0], [1], [0, 0, 1, 1], [], []>} : vector<8x64xf32>, vector<64x64xf32>, vector<8x64xf32> -> vector<8x64xf32>
    %c3_107 = arith.constant 3 : index
    %c0_108 = arith.constant 0 : index
    %c0_109 = arith.constant 0 : index
    %108 = vector.load %arg8[%c3_107, %c0_108, %c0_109] : memref<9x8x8xf32, #tpu.memory_space<vmem>>, vector<1x8x8xf32>
    %109 = vector.shape_cast %108 : vector<1x8x8xf32> to vector<8x8xf32>
    %cst_110 = arith.constant dense<0.000000e+00> : vector<8x64xf32>
    %110 = tpu.matmul %109, %107, %cst_110 {dimension_numbers = #tpu.dot_dimension_numbers<[1], [0], [0], [1], [0, 0, 1, 1], [], []>} : vector<8x8xf32>, vector<8x64xf32>, vector<8x64xf32> -> vector<8x64xf32>
    %111 = arith.addf %104, %110 : vector<8x64xf32>
    %c4_111 = arith.constant 4 : index
    %c0_112 = arith.constant 0 : index
    %c0_113 = arith.constant 0 : index
    %112 = vector.load %arg11[%c4_111, %c0_112, %c0_113] : memref<9x64x64xf32, #tpu.memory_space<vmem>>, vector<1x64x64xf32>
    %113 = vector.shape_cast %112 : vector<1x64x64xf32> to vector<64x64xf32>
    %cst_114 = arith.constant dense<0.000000e+00> : vector<8x64xf32>
    %114 = tpu.matmul %83, %113, %cst_114 {dimension_numbers = #tpu.dot_dimension_numbers<[1], [0], [0], [1], [0, 0, 1, 1], [], []>} : vector<8x64xf32>, vector<64x64xf32>, vector<8x64xf32> -> vector<8x64xf32>
    %c4_115 = arith.constant 4 : index
    %c0_116 = arith.constant 0 : index
    %c0_117 = arith.constant 0 : index
    %115 = vector.load %arg8[%c4_115, %c0_116, %c0_117] : memref<9x8x8xf32, #tpu.memory_space<vmem>>, vector<1x8x8xf32>
    %116 = vector.shape_cast %115 : vector<1x8x8xf32> to vector<8x8xf32>
    %cst_118 = arith.constant dense<0.000000e+00> : vector<8x64xf32>
    %117 = tpu.matmul %116, %114, %cst_118 {dimension_numbers = #tpu.dot_dimension_numbers<[1], [0], [0], [1], [0, 0, 1, 1], [], []>} : vector<8x8xf32>, vector<8x64xf32>, vector<8x64xf32> -> vector<8x64xf32>
    %118 = arith.addf %111, %117 : vector<8x64xf32>
    %c5_119 = arith.constant 5 : index
    %c0_120 = arith.constant 0 : index
    %c0_121 = arith.constant 0 : index
    %119 = vector.load %arg11[%c5_119, %c0_120, %c0_121] : memref<9x64x64xf32, #tpu.memory_space<vmem>>, vector<1x64x64xf32>
    %120 = vector.shape_cast %119 : vector<1x64x64xf32> to vector<64x64xf32>
    %cst_122 = arith.constant dense<0.000000e+00> : vector<8x64xf32>
    %121 = tpu.matmul %83, %120, %cst_122 {dimension_numbers = #tpu.dot_dimension_numbers<[1], [0], [0], [1], [0, 0, 1, 1], [], []>} : vector<8x64xf32>, vector<64x64xf32>, vector<8x64xf32> -> vector<8x64xf32>
    %c5_123 = arith.constant 5 : index
    %c0_124 = arith.constant 0 : index
    %c0_125 = arith.constant 0 : index
    %122 = vector.load %arg8[%c5_123, %c0_124, %c0_125] : memref<9x8x8xf32, #tpu.memory_space<vmem>>, vector<1x8x8xf32>
    %123 = vector.shape_cast %122 : vector<1x8x8xf32> to vector<8x8xf32>
    %cst_126 = arith.constant dense<0.000000e+00> : vector<8x64xf32>
    %124 = tpu.matmul %123, %121, %cst_126 {dimension_numbers = #tpu.dot_dimension_numbers<[1], [0], [0], [1], [0, 0, 1, 1], [], []>} : vector<8x8xf32>, vector<8x64xf32>, vector<8x64xf32> -> vector<8x64xf32>
    %125 = arith.addf %118, %124 : vector<8x64xf32>
    %c6_127 = arith.constant 6 : index
    %c0_128 = arith.constant 0 : index
    %c0_129 = arith.constant 0 : index
    %126 = vector.load %arg11[%c6_127, %c0_128, %c0_129] : memref<9x64x64xf32, #tpu.memory_space<vmem>>, vector<1x64x64xf32>
    %127 = vector.shape_cast %126 : vector<1x64x64xf32> to vector<64x64xf32>
    %cst_130 = arith.constant dense<0.000000e+00> : vector<8x64xf32>
    %128 = tpu.matmul %83, %127, %cst_130 {dimension_numbers = #tpu.dot_dimension_numbers<[1], [0], [0], [1], [0, 0, 1, 1], [], []>} : vector<8x64xf32>, vector<64x64xf32>, vector<8x64xf32> -> vector<8x64xf32>
    %c6_131 = arith.constant 6 : index
    %c0_132 = arith.constant 0 : index
    %c0_133 = arith.constant 0 : index
    %129 = vector.load %arg8[%c6_131, %c0_132, %c0_133] : memref<9x8x8xf32, #tpu.memory_space<vmem>>, vector<1x8x8xf32>
    %130 = vector.shape_cast %129 : vector<1x8x8xf32> to vector<8x8xf32>
    %cst_134 = arith.constant dense<0.000000e+00> : vector<8x64xf32>
    %131 = tpu.matmul %130, %128, %cst_134 {dimension_numbers = #tpu.dot_dimension_numbers<[1], [0], [0], [1], [0, 0, 1, 1], [], []>} : vector<8x8xf32>, vector<8x64xf32>, vector<8x64xf32> -> vector<8x64xf32>
    %132 = arith.addf %125, %131 : vector<8x64xf32>
    %c7_135 = arith.constant 7 : index
    %c0_136 = arith.constant 0 : index
    %c0_137 = arith.constant 0 : index
    %133 = vector.load %arg11[%c7_135, %c0_136, %c0_137] : memref<9x64x64xf32, #tpu.memory_space<vmem>>, vector<1x64x64xf32>
    %134 = vector.shape_cast %133 : vector<1x64x64xf32> to vector<64x64xf32>
    %cst_138 = arith.constant dense<0.000000e+00> : vector<8x64xf32>
    %135 = tpu.matmul %83, %134, %cst_138 {dimension_numbers = #tpu.dot_dimension_numbers<[1], [0], [0], [1], [0, 0, 1, 1], [], []>} : vector<8x64xf32>, vector<64x64xf32>, vector<8x64xf32> -> vector<8x64xf32>
    %c7_139 = arith.constant 7 : index
    %c0_140 = arith.constant 0 : index
    %c0_141 = arith.constant 0 : index
    %136 = vector.load %arg8[%c7_139, %c0_140, %c0_141] : memref<9x8x8xf32, #tpu.memory_space<vmem>>, vector<1x8x8xf32>
    %137 = vector.shape_cast %136 : vector<1x8x8xf32> to vector<8x8xf32>
    %cst_142 = arith.constant dense<0.000000e+00> : vector<8x64xf32>
    %138 = tpu.matmul %137, %135, %cst_142 {dimension_numbers = #tpu.dot_dimension_numbers<[1], [0], [0], [1], [0, 0, 1, 1], [], []>} : vector<8x8xf32>, vector<8x64xf32>, vector<8x64xf32> -> vector<8x64xf32>
    %139 = arith.addf %132, %138 : vector<8x64xf32>
    %c8_143 = arith.constant 8 : index
    %c0_144 = arith.constant 0 : index
    %c0_145 = arith.constant 0 : index
    %140 = vector.load %arg11[%c8_143, %c0_144, %c0_145] : memref<9x64x64xf32, #tpu.memory_space<vmem>>, vector<1x64x64xf32>
    %141 = vector.shape_cast %140 : vector<1x64x64xf32> to vector<64x64xf32>
    %cst_146 = arith.constant dense<0.000000e+00> : vector<8x64xf32>
    %142 = tpu.matmul %83, %141, %cst_146 {dimension_numbers = #tpu.dot_dimension_numbers<[1], [0], [0], [1], [0, 0, 1, 1], [], []>} : vector<8x64xf32>, vector<64x64xf32>, vector<8x64xf32> -> vector<8x64xf32>
    %c8_147 = arith.constant 8 : index
    %c0_148 = arith.constant 0 : index
    %c0_149 = arith.constant 0 : index
    %143 = vector.load %arg8[%c8_147, %c0_148, %c0_149] : memref<9x8x8xf32, #tpu.memory_space<vmem>>, vector<1x8x8xf32>
    %144 = vector.shape_cast %143 : vector<1x8x8xf32> to vector<8x8xf32>
    %cst_150 = arith.constant dense<0.000000e+00> : vector<8x64xf32>
    %145 = tpu.matmul %144, %142, %cst_150 {dimension_numbers = #tpu.dot_dimension_numbers<[1], [0], [0], [1], [0, 0, 1, 1], [], []>} : vector<8x8xf32>, vector<8x64xf32>, vector<8x64xf32> -> vector<8x64xf32>
    %146 = arith.addf %139, %145 : vector<8x64xf32>
    %c0_151 = arith.constant 0 : index
    %c0_152 = arith.constant 0 : index
    %147 = vector.load %arg9[%c0_151, %c0_152] : memref<8x1xf32, #tpu.memory_space<vmem>>, vector<8x1xf32>
    %148 = vector.broadcast %147 : vector<8x1xf32> to vector<8x64xf32>
    %149 = arith.mulf %146, %148 : vector<8x64xf32>
    %c0_153 = arith.constant 0 : index
    %c0_154 = arith.constant 0 : index
    %c0_155 = arith.constant 0 : index
    %150 = vector.load %arg12[%c0_153, %c0_154, %c0_155] : memref<1x8x64xf32, #tpu.memory_space<vmem>>, vector<1x8x64xf32>
    %151 = vector.shape_cast %150 : vector<1x8x64xf32> to vector<8x64xf32>
    %152 = vector.shape_cast %149 : vector<8x64xf32> to vector<1x8x64xf32>
    tpu.vector_store %arg12[%c0_153, %c0_154, %c0_155], %152 {strides = array<i32>} : memref<1x8x64xf32, #tpu.memory_space<vmem>>, vector<1x8x64xf32>,
    return
  }
  func.func @transform_0(%arg0: i32) -> (i32, i32, i32) {
    %c0_i32 = arith.constant 0 : i32
    %c0_i32_0 = arith.constant 0 : i32
    %c0_i32_1 = arith.constant 0 : i32
    return %arg0, %c0_i32, %c0_i32_0 : i32, i32, i32
  }
  func.func @transform_1(%arg0: i32) -> (i32, i32) {
    %c0_i32 = arith.constant 0 : i32
    %c0_i32_0 = arith.constant 0 : i32
    %c0_i32_1 = arith.constant 0 : i32
    return %c0_i32, %c0_i32_0 : i32, i32
  }
  func.func @transform_2(%arg0: i32) -> (i32, i32) {
    %c0_i32 = arith.constant 0 : i32
    %c0_i32_0 = arith.constant 0 : i32
    %c0_i32_1 = arith.constant 0 : i32
    return %c0_i32, %c0_i32_0 : i32, i32
  }
  func.func @transform_3(%arg0: i32) -> (i32, i32, i32) {
    %c0_i32 = arith.constant 0 : i32
    %c0_i32_0 = arith.constant 0 : i32
    %c0_i32_1 = arith.constant 0 : i32
    %c0_i32_2 = arith.constant 0 : i32
    return %c0_i32, %c0_i32_0, %c0_i32_1 : i32, i32, i32
  }
  func.func @transform_4(%arg0: i32) -> (i32, i32) {
    %c0_i32 = arith.constant 0 : i32
    %c0_i32_0 = arith.constant 0 : i32
    %c0_i32_1 = arith.constant 0 : i32
    return %c0_i32, %c0_i32_0 : i32, i32
  }
  func.func @transform_5(%arg0: i32) -> (i32, i32) {
    %c0_i32 = arith.constant 0 : i32
    %c0_i32_0 = arith.constant 0 : i32
    %c0_i32_1 = arith.constant 0 : i32
    return %c0_i32, %c0_i32_0 : i32, i32
  }
  func.func @transform_6(%arg0: i32) -> (i32, i32) {
    %c0_i32 = arith.constant 0 : i32
    %c0_i32_0 = arith.constant 0 : i32
    %c0_i32_1 = arith.constant 0 : i32
    return %c0_i32, %c0_i32_0 : i32, i32
  }
  func.func @transform_7(%arg0: i32) -> (i32, i32, i32) {
    %c0_i32 = arith.constant 0 : i32
    %c0_i32_0 = arith.constant 0 : i32
    %c0_i32_1 = arith.constant 0 : i32
    %c0_i32_2 = arith.constant 0 : i32
    return %c0_i32, %c0_i32_0, %c0_i32_1 : i32, i32, i32
  }
  func.func @transform_8(%arg0: i32) -> (i32, i32) {
    %c0_i32 = arith.constant 0 : i32
    %c0_i32_0 = arith.constant 0 : i32
    %c0_i32_1 = arith.constant 0 : i32
    return %c0_i32, %c0_i32_0 : i32, i32
  }
  func.func @transform_9(%arg0: i32) -> (i32, i32, i32) {
    %c0_i32 = arith.constant 0 : i32
    %c0_i32_0 = arith.constant 0 : i32
    %c0_i32_1 = arith.constant 0 : i32
    %c0_i32_2 = arith.constant 0 : i32
    return %c0_i32, %c0_i32_0, %c0_i32_1 : i32, i32, i32
  }
  func.func @transform_10(%arg0: i32) -> (i32, i32, i32) {
    %c0_i32 = arith.constant 0 : i32
    %c0_i32_0 = arith.constant 0 : i32
    %c0_i32_1 = arith.constant 0 : i32
    %c0_i32_2 = arith.constant 0 : i32
    return %c0_i32, %c0_i32_0, %c0_i32_1 : i32, i32, i32
  }
  func.func @transform_11(%arg0: i32) -> (i32, i32, i32) {
    %c0_i32 = arith.constant 0 : i32
    %c0_i32_0 = arith.constant 0 : i32
    %c0_i32_1 = arith.constant 0 : i32
    return %arg0, %c0_i32, %c0_i32_0 : i32, i32, i32
  }
}

</mosaic_0001>

<bundles_post_ra>
// kernel: tpu_custom_call.1
= control target key start
LH: loop header
LB: loop body
LE: loop exit
PB: predicated region body
PF: predicated region fallthrough
CT: control target
= control target key end

     0   :  { %s3881_s0 = inlined_call_operand.vmem [shape: f32[2,4,256], index: 0, kind: input, shape index: {}]   ;;  %s3882_s1 = inlined_call_operand.vmem [shape: f32[4,1], index: 1, kind: input, shape index: {}]   ;;  %s3883_s2 = inlined_call_operand.vmem [shape: f32[4,1], index: 2, kind: input, shape index: {}]   ;;  %s3884_s3 = inlined_call_operand.vmem [shape: f32[9,8,4], index: 3, kind: input, shape index: {}]   ;;  %s3885_s4 = inlined_call_operand.vmem [shape: f32[8,1], index: 4, kind: input, shape index: {}]   ;;  %s3886_s5 = inlined_call_operand.vmem [shape: f32[8,1], index: 5, kind: input, shape index: {}]   ;;  %s3887_s6 = inlined_call_operand.vmem [shape: f32[8,4], index: 6, kind: input, shape index: {}]   ;;  %s3888_s7 = inlined_call_operand.vmem [shape: f32[9,8,8], index: 7, kind: input, shape index: {}]   ;;  %s3889_s8 = inlined_call_operand.vmem [shape: f32[8,1], index: 8, kind: input, shape index: {}]   ;;  %s3890_s9 = inlined_call_operand.vmem [shape: f32[9,256,64], index: 9, kind: input, shape index: {}]   ;;  %s3891_s10 = inlined_call_operand.vmem [shape: f32[9,64,64], index: 10, kind: input, shape index: {}]   ;;  %s3892_s11 = inlined_call_operand.hbm [shape: f32[2,8,64], index: 11, kind: output, shape index: {}]  }
   0x1   :  { %3893 = sst [smem:[#allocation5_spill]] %s3882_s1 }
   0x2   :  { %16 = vsyncpa [#allocation3], 0 }
   0x3   :  { %18 = vsyncpa [#allocation3 + $0x1], 0  ;;  %s2546_s17 = smov 0   ;;  %s2548_s18 = smov 0  }
   0x4   :  { %s2550_s19 = smov 0   ;;  %s2552_s20 = smov 0  }
   0x5 LB: > { %s2567_s21 = sadd.s32 4294967295, %s2482_s20   ;;  %s1990_s22 = sadd.s32 4294967294, %s2482_s20   ;;  %s2482_s20 = sphi %s2552_s20, %s3900_s20   ;;  %s2478_s19 = sphi %s2550_s19, %s3899_s19   ;;  %s2474_s18 = sphi %s2548_s18, %s3898_s18   ;;  %s2470_s17 = sphi %s2546_s17, %s3897_s17  }
   0x6   : > { %s2571_s23 = sadd.s32 1, %s2482_s20   ;;  %s267_s24 = sadd.s32 1, %s2478_s19 }
   0x7   : > { %s264_s25 = ssub.s32 %s2482_s20, %s2571_s23  ;;  %p277_p0 = scmp.ne.s32.totalorder %s2478_s19, %s2474_s18 }
   0x8   : > { %p265_p1 = scmp.eq.s32.totalorder %s264_s25, 0  ;;  %p278_p2 = scmp.eq.s32.totalorder %s2567_s21, 1 }
   0x9   : > { %p283_p3 = scmp.ne.s32.totalorder %s2474_s18, %s2470_s17  ;;  %p284_p4 = scmp.eq.s32.totalorder %s1990_s22, 1 }
   0xa   : > { %s2582_s26 = scalar_select %p265_p1, %s2478_s19, %s267_s24  }
   0xb   : > { %p2584_p5 = por %p278_p2, %p277_p0  ;;  %p2588_p6 = por %p284_p4, %p283_p3 }
   0xc   : > { %p1993_p7 = scmp.ge.s32.totalorder %s2482_s20, 1  ;;  %p340_p8 = scmp.lt.s32.totalorder %s2482_s20, 3 }
   0xe   : > { %p341_p9 = pnand %p1993_p7, %p340_p8 }
   0xf   : > { %s3896_s1 = sld [smem:[#allocation5_spill]] (!%p341_p9)  ;;  %p380_p10 = scmp.lt.s32.totalorder (!%p341_p9), %s2567_s21, 1 }
  0x10   : > { %344 = sbr.rel (%p341_p9) target bundleno = 1989 (0x7c5), region = 64  ;;  %s2372_s30 = sshll.u32 (!%p341_p9), %s2567_s21, 3 }
  0x11   : > { %s1926_s15 = scalar_lea.hbm (!%p341_p9), %s3892_s11, %s2372_s30 }
  0x12   : > { %s1930_s24 = sshll.u32 (!%p341_p9), %s1926_s15, 4  ;;  %s1931_s24 = int_to_ptr.hbm [resolvable:$true] %s1930_s24 }
  0x15   : > { %v386_v0 = vld [vmem:[%s3896_s1] sm:$0xf]  ;;  %v2028_v1 = vld [vmem:[%s3890_s9 + $0x1f8] sm:$0xff]  ;;  %v2484_v2 = vmov 0   ;;  %v2027_v3 = vld [vmem:[%s3890_s9 + $0x1f0] sm:$0xff]  ;;  %s381_s14 = scalar_select %p380_p10, %s2567_s21, 1 }
  0x16   : > { %2417 = vset.pattern.permute.xlu0 %v2484_v2  ;;  %546 = vmatpush.msra.mxu3 %v2028_v1  ;;  %v2026_v4 = vld [vmem:[%s3890_s9 + $0x1e8] sm:$0xff]  ;;  %v2012_v5 = vld [vmem:[%s3890_s9 + $0x178] sm:$0xff]  ;;  %v2011_v6 = vld [vmem:[%s3890_s9 + $0x170] sm:$0xff]  ;;  %vm572_vm0 = vcmask 1043456   ;;  %vm568_vm1 = vcmask 31744   ;;  %vm1395_vm2 = vcmask 523264  }
  0x17   : > { %389 = vperm.xlu0 %2417, %v386_v0   ;;  %2418 = vset.pattern.permute.xlu1 %v2484_v2  ;;  %v2025_v7 = vld [vmem:[%s3890_s9 + $0x1e0] sm:$0xff]  ;;  %v2010_v8 = vld [vmem:[%s3890_s9 + $0x168] sm:$0xff]  ;;  %v2024_v9 = vld [vmem:[%s3890_s9 + $0x1d8] sm:$0xff]  ;;  %s2375_s25 = sshll.u32 %s381_s14, 3  ;;  %vm1420_vm3 = vcmask 64512   ;;  %s377_s1 = sand.u32 1, %s2474_s18  }
  0x18   : > { %547 = vmatpush.msra.mxu3 %v2027_v3  ;;  %526 = vmatpush.msra.mxu2 %v2012_v5  ;;  %v2009_v10 = vld [vmem:[%s3890_s9 + $0x160] sm:$0xff]  ;;  %v424_v12 = vld [vmem:[%s3890_s9 + $0x78] sm:$0xff]  ;;  %v2023_v14 = vld [vmem:[%s3890_s9 + $0x1d0] sm:$0xff]  ;;  %s384_s22 = scalar_lea.vmem %s3881_s0, %s2375_s25  ;;  %s1994_s25 = sshll.u32 %s377_s1, 3 }
  0x19   : > { %2419 = vset.pattern.permute.xlu2 %v2484_v2  ;;  %v397_v11 = vld [vmem:[%s3883_s2] sm:$0xf]  ;;  %v440_v13 = vld [vmem:[%s3890_s9 + $0xf8] sm:$0xff]  ;;  %447 = vmatpush.msra.mxu0 %v424_v12  ;;  %v423_v16 = vld [vmem:[%s3890_s9 + $0x70] sm:$0xff]  ;;  %s379_s16 = scalar_lea.vmem [#allocation2], %s1994_s25  ;;  %s1916_s14 = scalar_lea.sflag [#allocation3], %s377_s1 }
  0x1a   : > { %548 = vmatpush.msra.mxu3 %v2026_v4  ;;  %527 = vmatpush.msra.mxu2 %v2011_v6  ;;  %v2008_v15 = vld [vmem:[%s3890_s9 + $0x158] sm:$0xff]  ;;  %v439_v17 = vld [vmem:[%s3890_s9 + $0xf0] sm:$0xff]  ;;  %v2022_v18 = vld [vmem:[%s3890_s9 + $0x1c8] sm:$0xff]  ;;  %s2434_s21 = sshra.s32 %s1931_s24, 4  ;;  %s2440_s25 = scalar_lea.hbm %s3892_s11, 16  ;;  %s2435_s21 = int_to_ptr.hbm [resolvable:$true] %s2434_s21 }
  0x1b   : > { %467 = vmatpush.msra.mxu1 %v440_v13  ;;  %v2007_v19 = vld [vmem:[%s3890_s9 + $0x150] sm:$0xff]  ;;  %448 = vmatpush.msra.mxu0 %v423_v16  ;;  %v422_v20 = vld [vmem:[%s3890_s9 + $0x68] sm:$0xff]  ;;  %v421_v22 = vld [vmem:[%s3890_s9 + $0x60] sm:$0xff]  ;;  %s2436_s29 = scalar_lea.hbm %s2435_s21, 8  ;;  %p2441_p0 = scmp.lt.s32.totalorder %s2435_s21, %s3892_s11 }
  0x1c   : > { %549 = vmatpush.msra.mxu3 %v2025_v7  ;;  %528 = vmatpush.msra.mxu2 %v2010_v8  ;;  %v438_v21 = vld [vmem:[%s3890_s9 + $0xe8] sm:$0xff]  ;;  %v2021_v23 = vld [vmem:[%s3890_s9 + $0x1c0] sm:$0xff]  ;;  %v420_v26 = vld [vmem:[%s3890_s9 + $0x58] sm:$0xff]  ;;  %p2437_p11 = scmp.ne.s32.totalorder %s2435_s21, %s2436_s29  ;;  %p2442_p1 = scmp.lt.s32.totalorder %s2440_s25, %s2436_s29 }
  0x1d   : > { %v2006_v24 = vld [vmem:[%s3890_s9 + $0x148] sm:$0xff]  ;;  %468 = vmatpush.msra.mxu1 %v439_v17  ;;  %449 = vmatpush.msra.mxu0 %v422_v20  ;;  %v437_v25 = vld [vmem:[%s3890_s9 + $0xe0] sm:$0xff]  ;;  %v2020_v27 = vld [vmem:[%s3890_s9 + $0x1b8] sm:$0xff] }
  0x1e   : > { %550 = vmatpush.msra.mxu3 %v2024_v9  ;;  %529 = vmatpush.msra.mxu2 %v2009_v10  ;;  %v2005_v28 = vld [vmem:[%s3890_s9 + $0x140] sm:$0xff]  ;;  %v436_v29 = vld [vmem:[%s3890_s9 + $0xd8] sm:$0xff]  ;;  %v2019_v30 = vld [vmem:[%s3890_s9 + $0x1b0] sm:$0xff]  ;;  %p2438_p12 = pnand %p2437_p11, %p2584_p5  ;;  %p2443_p2 = por %p2442_p1, %p2441_p0 }
  0x1f   : > { %400 = vperm.xlu0 %2417, %v397_v11   ;;  %469 = vmatpush.msra.mxu1 %v438_v21  ;;  %v2004_v31 = vld [vmem:[%s3890_s9 + $0x138] sm:$0xff]  ;;  %v2018_v32 = vld [vmem:[%s3890_s9 + $0x1a8] sm:$0xff]  ;;  %v2003_v33 = vld [vmem:[%s3890_s9 + $0x130] sm:$0xff] }
  0x20   : > { %551 = vmatpush.msra.mxu3 %v2023_v14  ;;  %530 = vmatpush.msra.mxu2 %v2008_v15  ;;  %v2017_v34 = vld [vmem:[%s3890_s9 + $0x1a0] sm:$0xff]  ;;  %v2002_v35 = vld [vmem:[%s3890_s9 + $0x128] sm:$0xff]  ;;  %v2016_v36 = vld [vmem:[%s3890_s9 + $0x198] sm:$0xff]  ;;  %p2439_p13 = pneg %p2438_p12 }
  0x21   : > { %450 = vmatpush.msra.mxu0 %v421_v22  ;;  %470 = vmatpush.msra.mxu1 %v437_v25  ;;  %v2001_v37 = vld [vmem:[%s3890_s9 + $0x120] sm:$0xff]  ;;  %v2015_v38 = vld [vmem:[%s3890_s9 + $0x190] sm:$0xff]  ;;  %v2014_v39 = vld [vmem:[%s3890_s9 + $0x188] sm:$0xff] }
  0x22   : > { %552 = vmatpush.msra.mxu3 %v2022_v18  ;;  %531 = vmatpush.msra.mxu2 %v2007_v19  ;;  %v2013_v40 = vld [vmem:[%s3890_s9 + $0x180] sm:$0xff]  ;;  %v2065_v41 = vld [vmem:[%s3890_s9 + $0x2f8] sm:$0xff]  ;;  %v419_v43 = vld [vmem:[%s3890_s9 + $0x50] sm:$0xff]  ;;  %p2444_p3 = pnand %p2443_p2, %p2439_p13 }
  0x23   : > { %451 = vmatpush.msra.mxu0 %v420_v26  ;;  %471 = vmatpush.msra.mxu1 %v436_v29  ;;  %v2000_v42 = vld [vmem:[%s3890_s9 + $0x118] sm:$0xff]  ;;  %v435_v44 = vld [vmem:[%s3890_s9 + $0xd0] sm:$0xff]  ;;  %v418_v47 = vld [vmem:[%s3890_s9 + $0x48] sm:$0xff] }
  0x24   : > { %553 = vmatpush.msra.mxu3 %v2021_v23  ;;  %532 = vmatpush.msra.mxu2 %v2006_v24  ;;  %v2064_v45 = vld [vmem:[%s3890_s9 + $0x2f0] sm:$0xff]  ;;  %v434_v48 = vld [vmem:[%s3890_s9 + $0xc8] sm:$0xff]  ;;  %v417_v51 = vld [vmem:[%s3890_s9 + $0x40] sm:$0xff] }
  0x25   : > { %452 = vmatpush.msra.mxu0 %v419_v43  ;;  %472 = vmatpush.msra.mxu1 %v435_v44  ;;  %v1999_v46 = vld [vmem:[%s3890_s9 + $0x110] sm:$0xff]  ;;  %v2063_v49 = vld [vmem:[%s3890_s9 + $0x2e8] sm:$0xff]  ;;  %v433_v52 = vld [vmem:[%s3890_s9 + $0xc0] sm:$0xff] }
  0x26   : > { %554 = vmatpush.msra.mxu3 %v2020_v27  ;;  %533 = vmatpush.msra.mxu2 %v2005_v28  ;;  %v1998_v50 = vld [vmem:[%s3890_s9 + $0x108] sm:$0xff]  ;;  %v2062_v53 = vld [vmem:[%s3890_s9 + $0x2e0] sm:$0xff]  ;;  %v416_v55 = vld [vmem:[%s3890_s9 + $0x38] sm:$0xff] }
  0x27   : > { %453 = vmatpush.msra.mxu0 %v418_v47  ;;  %473 = vmatpush.msra.mxu1 %v434_v48  ;;  %v1997_v54 = vld [vmem:[%s3890_s9 + $0x100] sm:$0xff]  ;;  %v432_v56 = vld [vmem:[%s3890_s9 + $0xb8] sm:$0xff]  ;;  %v415_v59 = vld [vmem:[%s3890_s9 + $0x30] sm:$0xff] }
  0x28   : > { %555 = vmatpush.msra.mxu3 %v2019_v30  ;;  %534 = vmatpush.msra.mxu2 %v2004_v31  ;;  %v2049_v57 = vld [vmem:[%s3890_s9 + $0x278] sm:$0xff]  ;;  %v431_v60 = vld [vmem:[%s3890_s9 + $0xb0] sm:$0xff]  ;;  %v414_v63 = vld [vmem:[%s3890_s9 + $0x28] sm:$0xff]  ;;  %v2485_v31 = vmov 839922192  }
  0x29   : > { %454 = vmatpush.msra.mxu0 %v417_v51  ;;  %474 = vmatpush.msra.mxu1 %v433_v52  ;;  %v2061_v58 = vld [vmem:[%s3890_s9 + $0x2d8] sm:$0xff]  ;;  %v2048_v61 = vld [vmem:[%s3890_s9 + $0x270] sm:$0xff]  ;;  %v430_v0 = vld [vmem:[%s3890_s9 + $0xa8] sm:$0xff] }
  0x2a   : > { %556 = vmatpush.msra.mxu3 %v2018_v32  ;;  %535 = vmatpush.msra.mxu2 %v2003_v33  ;;  %v2060_v62 = vld [vmem:[%s3890_s9 + $0x2d0] sm:$0xff]  ;;  %v2047_v1 = vld [vmem:[%s3890_s9 + $0x268] sm:$0xff]  ;;  %v413_v3 = vld [vmem:[%s3890_s9 + $0x20] sm:$0xff]  ;;  %v392_v32 = vunpack.c.l.s4 %v2485_v31 }
  0x2b   : > { %455 = vmatpush.msra.mxu0 %v416_v55  ;;  %475 = vmatpush.msra.mxu1 %v432_v56  ;;  %v2059_v2 = vld [vmem:[%s3890_s9 + $0x2c8] sm:$0xff]  ;;  %v429_v4 = vld [vmem:[%s3890_s9 + $0xa0] sm:$0xff]  ;;  %v412_v7 = vld [vmem:[%s3890_s9 + $0x18] sm:$0xff] }
  0x2c   : > { %557 = vmatpush.msra.mxu3 %v2017_v34  ;;  %536 = vmatpush.msra.mxu2 %v2002_v35  ;;  %v2046_v5 = vld [vmem:[%s3890_s9 + $0x260] sm:$0xff]  ;;  %v428_v8 = vld [vmem:[%s3890_s9 + $0x98] sm:$0xff]  ;;  %v411_v11 = vld [vmem:[%s3890_s9 + $0x10] sm:$0xff]  ;;  %v393_v35 = vunpack.c.0.s8 %v392_v32 }
  0x2d   : > { %456 = vmatpush.msra.mxu0 %v415_v59  ;;  %476 = vmatpush.msra.mxu1 %v431_v60  ;;  %v2058_v6 = vld [vmem:[%s3890_s9 + $0x2c0] sm:$0xff]  ;;  %v2045_v9 = vld [vmem:[%s3890_s9 + $0x258] sm:$0xff]  ;;  %v427_v12 = vld [vmem:[%s3890_s9 + $0x90] sm:$0xff] }
  0x2e   : > { %558 = vmatpush.msra.mxu3 %v2016_v36  ;;  %537 = vmatpush.msra.mxu2 %v2001_v37  ;;  %v2057_v10 = vld [vmem:[%s3890_s9 + $0x2b8] sm:$0xff]  ;;  %v2044_v13 = vld [vmem:[%s3890_s9 + $0x250] sm:$0xff]  ;;  %v410_v15 = vld [vmem:[%s3890_s9 + $0x8] sm:$0xff] }
  0x2f   : > { %457 = vmatpush.msra.mxu0 %v414_v63  ;;  %477 = vmatpush.msra.mxu1 %v430_v0  ;;  %v2056_v14 = vld [vmem:[%s3890_s9 + $0x2b0] sm:$0xff]  ;;  %v426_v16 = vld [vmem:[%s3890_s9 + $0x88] sm:$0xff]  ;;  %v409_v19 = vld [vmem:[%s3890_s9] sm:$0xff] }
  0x30   : > { %559 = vmatpush.msra.mxu3 %v2015_v38  ;;  %538 = vmatpush.msra.mxu2 %v2000_v42  ;;  %v2043_v17 = vld [vmem:[%s3890_s9 + $0x248] sm:$0xff]  ;;  %v425_v20 = vld [vmem:[%s3890_s9 + $0x80] sm:$0xff]  ;;  %v2041_v23 = vld [vmem:[%s3890_s9 + $0x238] sm:$0xff] }
  0x31   : > { %458 = vmatpush.msra.mxu0 %v413_v3  ;;  %478 = vmatpush.msra.mxu1 %v429_v4  ;;  %v2055_v18 = vld [vmem:[%s3890_s9 + $0x2a8] sm:$0xff]  ;;  %v2042_v21 = vld [vmem:[%s3890_s9 + $0x240] sm:$0xff]  ;;  %v2053_v24 = vld [vmem:[%s3890_s9 + $0x298] sm:$0xff] }
  0x32   : > { %560 = vmatpush.msra.mxu3 %v2014_v39  ;;  %539 = vmatpush.msra.mxu2 %v1999_v46  ;;  %v2054_v22 = vld [vmem:[%s3890_s9 + $0x2a0] sm:$0xff]  ;;  %v2040_v25 = vld [vmem:[%s3890_s9 + $0x230] sm:$0xff]  ;;  %v2039_v27 = vld [vmem:[%s3890_s9 + $0x228] sm:$0xff] }
  0x33   : > { %459 = vmatpush.msra.mxu0 %v412_v7  ;;  %479 = vmatpush.msra.mxu1 %v428_v8  ;;  %v2052_v26 = vld [vmem:[%s3890_s9 + $0x290] sm:$0xff]  ;;  %v2051_v28 = vld [vmem:[%s3890_s9 + $0x288] sm:$0xff]  ;;  %v2038_v29 = vld [vmem:[%s3890_s9 + $0x220] sm:$0xff] }
  0x34   : > { %561 = vmatpush.msra.mxu3 %v2013_v40  ;;  %540 = vmatpush.msra.mxu2 %v1998_v50  ;;  %v2050_v30 = vld [vmem:[%s3890_s9 + $0x280] sm:$0xff]  ;;  %v2037_v34 = vld [vmem:[%s3890_s9 + $0x218] sm:$0xff]  ;;  %v2036_v36 = vld [vmem:[%s3890_s9 + $0x210] sm:$0xff] }
  0x35   : > { %460 = vmatpush.msra.mxu0 %v411_v11  ;;  %480 = vmatpush.msra.mxu1 %v427_v12  ;;  %v2035_v37 = vld [vmem:[%s3890_s9 + $0x208] sm:$0xff]  ;;  %v385_v39 = vld [vmem:[%s384_s22] sm:$0xff]  ;;  %v2119_v48 = vld [vmem:[%s3890_s9 + $0x478] sm:$0xff]  ;;  %s1928_s22 = sshll.u32 %s379_s16, 4  ;;  %s1929_s22 = int_to_ptr.vmem [resolvable:$true] %s1928_s22 }
  0x36   : > { %680 = vmatpush.msrb.mxu3 %v2065_v41  ;;  %541 = vmatpush.msra.mxu2 %v1997_v54  ;;  %v2034_v40 = vld [vmem:[%s3890_s9 + $0x200] sm:$0xff]  ;;  %v2118_v51 = vld [vmem:[%s3890_s9 + $0x470] sm:$0xff]  ;;  %v2117_v52 = vld [vmem:[%s3890_s9 + $0x468] sm:$0xff] }
  0x37   : > { %461 = vmatpush.msra.mxu0 %v410_v15  ;;  %481 = vmatpush.msra.mxu1 %v426_v16  ;;  %v2115_v54 = vld [vmem:[%s3890_s9 + $0x458] sm:$0xff]  ;;  %v2112_v59 = vld [vmem:[%s3890_s9 + $0x440] sm:$0xff]  ;;  %v2110_v63 = vld [vmem:[%s3890_s9 + $0x430] sm:$0xff] }
  0x38   : > { %681 = vmatpush.msrb.mxu3 %v2064_v45  ;;  %660 = vmatpush.msrb.mxu2 %v2049_v57  ;;  %v2114_v57 = vld [vmem:[%s3890_s9 + $0x450] sm:$0xff]  ;;  %v2111_v60 = vld [vmem:[%s3890_s9 + $0x438] sm:$0xff]  ;;  %v2109_v0 = vld [vmem:[%s3890_s9 + $0x428] sm:$0xff] }
  0x39   : > { %462 = vmatpush.msra.mxu0 %v409_v19  ;;  %482 = vmatpush.msra.mxu1 %v425_v20  ;;  %v2104_v7 = vld [vmem:[%s3890_s9 + $0x400] sm:$0xff]  ;;  %v2083_v19 = vld [vmem:[%s3890_s9 + $0x370] sm:$0xff]  ;;  %v2082_v20 = vld [vmem:[%s3890_s9 + $0x368] sm:$0xff] }
  0x3a   : > { %682 = vmatpush.msrb.mxu3 %v2063_v49  ;;  %661 = vmatpush.msrb.mxu2 %v2048_v61  ;;  %v2075_v31 = vld [vmem:[%s3890_s9 + $0x330] sm:$0xff]  ;;  %v2074_v32 = vld [vmem:[%s3890_s9 + $0x328] sm:$0xff] }
  0x3c   : > { %683 = vmatpush.msrb.mxu3 %v2062_v53  ;;  %662 = vmatpush.msrb.mxu2 %v2047_v1  ;;  %v2116_v53 = vld [vmem:[%s3890_s9 + $0x460] sm:$0xff] }
  0x3d   : > { %v2108_v1 = vld [vmem:[%s3890_s9 + $0x420] sm:$0xff] }
  0x3e   : > { %684 = vmatpush.msrb.mxu3 %v2061_v58  ;;  %663 = vmatpush.msrb.mxu2 %v2046_v5  ;;  %v2113_v58 = vld [vmem:[%s3890_s9 + $0x448] sm:$0xff]  ;;  %v2106_v5 = vld [vmem:[%s3890_s9 + $0x410] sm:$0xff] }
  0x40   : > { %685 = vmatpush.msrb.mxu3 %v2060_v62  ;;  %664 = vmatpush.msrb.mxu2 %v2045_v9 }
  0x42   : > { %686 = vmatpush.msrb.mxu3 %v2059_v2  ;;  %665 = vmatpush.msrb.mxu2 %v2044_v13  ;;  %v2107_v2 = vld [vmem:[%s3890_s9 + $0x418] sm:$0xff] }
  0x44   : > { %687 = vmatpush.msrb.mxu3 %v2058_v6  ;;  %666 = vmatpush.msrb.mxu2 %v2043_v17  ;;  %v2105_v6 = vld [vmem:[%s3890_s9 + $0x408] sm:$0xff]  ;;  %v2084_v17 = vld [vmem:[%s3890_s9 + $0x378] sm:$0xff] }
  0x46   : > { %688 = vmatpush.msrb.mxu3 %v2057_v10  ;;  %667 = vmatpush.msrb.mxu2 %v2042_v21  ;;  %v2081_v21 = vld [vmem:[%s3890_s9 + $0x360] sm:$0xff] }
  0x48   : > { %689 = vmatpush.msrb.mxu3 %v2056_v14  ;;  %668 = vmatpush.msrb.mxu2 %v2041_v23  ;;  %v2079_v23 = vld [vmem:[%s3890_s9 + $0x350] sm:$0xff] }
  0x4a   : > { %690 = vmatpush.msrb.mxu3 %v2055_v18  ;;  %669 = vmatpush.msrb.mxu2 %v2040_v25  ;;  %v487_v18 = vld [vmem:[%s3884_s3] sm:$0xff] }
  0x4c   : > { %691 = vmatpush.msrb.mxu3 %v2054_v22  ;;  %670 = vmatpush.msrb.mxu2 %v2039_v27  ;;  %v2080_v22 = vld [vmem:[%s3890_s9 + $0x358] sm:$0xff] }
  0x4e   : > { %692 = vmatpush.msrb.mxu3 %v2053_v24  ;;  %671 = vmatpush.msrb.mxu2 %v2038_v29  ;;  %v2078_v24 = vld [vmem:[%s3890_s9 + $0x348] sm:$0xff] }
  0x4f   : > { %v2029_v29 = vld [vmem:[%s3884_s3 + $0x8] sm:$0xff] }
  0x50   : > { %693 = vmatpush.msrb.mxu3 %v2052_v26  ;;  %672 = vmatpush.msrb.mxu2 %v2037_v34 }
  0x52   : > { %694 = vmatpush.msrb.mxu3 %v2051_v28  ;;  %673 = vmatpush.msrb.mxu2 %v2036_v36  ;;  %v2077_v28 = vld [vmem:[%s3890_s9 + $0x340] sm:$0xff] }
  0x53   : > { %v2073_v36 = vld [vmem:[%s3890_s9 + $0x320] sm:$0xff] }
  0x54   : > { %695 = vmatpush.msrb.mxu3 %v2050_v30  ;;  %674 = vmatpush.msrb.mxu2 %v2035_v37  ;;  %v2076_v30 = vld [vmem:[%s3890_s9 + $0x338] sm:$0xff] }
  0x55   : > { %v2100_v37 = vld [vmem:[%s3890_s9 + $0x3f8] sm:$0xff] }
  0x56   : > { %675 = vmatpush.msrb.mxu2 %v2034_v40  ;;  %v2099_v40 = vld [vmem:[%s3890_s9 + $0x3f0] sm:$0xff] }
  0x89   : > { %v390_v33 = vpop.permute.xlu0 %389 }
  0x8a   : > { %v394_v38 = vperm.slane %v390_v33, %v393_v35 }
  0x8c   : > { %v396_v42 = vmul.f32 %v394_v38, %v385_v39  ;;  %v2066_v38 = vld [vmem:[%s3884_s3 + $0x10] sm:$0xff]  ;;  %v2072_v39 = vld [vmem:[%s3890_s9 + $0x318] sm:$0xff] }
  0x91   : > { %v401_v41 = vpop.permute.xlu0 %400 }
  0x92   : > { %v405_v43 = vperm.slane %v401_v41, %v393_v35  ;;  %v2071_v41 = vld [vmem:[%s3890_s9 + $0x310] sm:$0xff] }
  0x94   : > { %v407_v44 = vadd.f32 %v405_v43, %v396_v42  ;;  %v2098_v42 = vld [vmem:[%s3890_s9 + $0x3e8] sm:$0xff] }
  0x95   : > { %v2070_v43 = vld [vmem:[%s3890_s9 + $0x308] sm:$0xff] }
  0x96   : > { %v2893_v45 = vmax.f32 %v407_v44, 0.0  ;;  %v2097_v44 = vld [vmem:[%s3890_s9 + $0x3e0] sm:$0xff] }
  0x98   : > { %442 = vst [vmem:[#allocation1] ss:$2 sm:$0xff] %v2893_v45 }
  0x9f   : > { %v443_v46 = vld.sshfl [vmem:[#allocation1] sm:$0xff pattern:$0x75316420]  ;;  %v444_v47 = vld.sshfl [vmem:[#allocation1 + $0x8] sm:$0xff pattern:$0x75316420] }
  0xa0   : > { %463 = vmatmul.f32.vlgmr.msra.gmra.mxu0 %v443_v46  ;;  %483 = vmatmul.f32.vlgmr.msra.gmra.mxu1 %v444_v47  ;;  %521 = vst [vmem:[#allocation1] ss:$2 sm:$0xff] %v2893_v45  ;;  %v2096_v46 = vld [vmem:[%s3890_s9 + $0x3d8] sm:$0xff] }
  0xa1   : > { %v2135_v47 = vld [vmem:[%s3890_s9 + $0x4f8] sm:$0xff] }
  0xa7   : > { %v522_v49 = vld.sshfl [vmem:[#allocation1] sm:$0xff pattern:$0x75316420]  ;;  %v523_v50 = vld.sshfl [vmem:[#allocation1 + $0x8] sm:$0xff pattern:$0x75316420] }
  0xa8   : > { %542 = vmatmul.f32.vlgmr.msra.gmra.mxu2 %v522_v49  ;;  %562 = vmatmul.f32.vlgmr.msra.gmra.mxu3 %v523_v50  ;;  %655 = vst [vmem:[#allocation1] ss:$2 sm:$0xff] %v2893_v45  ;;  %v2134_v49 = vld [vmem:[%s3890_s9 + $0x4f0] sm:$0xff]  ;;  %v2094_v50 = vld [vmem:[%s3890_s9 + $0x3c8] sm:$0xff] }
  0xa9   : > { %874 = vmatpush.msra.mxu3 %v2119_v48  ;;  %v2095_v48 = vld [vmem:[%s3890_s9 + $0x3d0] sm:$0xff] }
  0xab   : > { %875 = vmatpush.msra.mxu3 %v2118_v51  ;;  %v2133_v51 = vld [vmem:[%s3890_s9 + $0x4e8] sm:$0xff] }
  0xad   : > { %876 = vmatpush.msra.mxu3 %v2117_v52  ;;  %v2093_v52 = vld [vmem:[%s3890_s9 + $0x3c0] sm:$0xff] }
  0xaf   : > { %877 = vmatpush.msra.mxu3 %v2116_v53  ;;  %v656_v55 = vld.sshfl [vmem:[#allocation1] sm:$0xff pattern:$0x75316420]  ;;  %v657_v56 = vld.sshfl [vmem:[#allocation1 + $0x8] sm:$0xff pattern:$0x75316420] }
  0xb0   : > { %676 = vmatmul.f32.vlgmr.msrb.gmra.mxu2 %v656_v55  ;;  %696 = vmatmul.f32.vlgmr.msrb.gmra.mxu3 %v657_v56  ;;  %762 = vst [vmem:[#allocation1] ss:$2 sm:$0xff] %v2893_v45  ;;  %v2132_v53 = vld [vmem:[%s3890_s9 + $0x4e0] sm:$0xff]  ;;  %v2131_v55 = vld [vmem:[%s3890_s9 + $0x4d8] sm:$0xff]  ;;  %v2091_v56 = vld [vmem:[%s3890_s9 + $0x3b0] sm:$0xff] }
  0xb1   : > { %878 = vmatpush.msra.mxu3 %v2115_v54  ;;  %v2092_v54 = vld [vmem:[%s3890_s9 + $0x3b8] sm:$0xff] }
  0xb3   : > { %879 = vmatpush.msra.mxu3 %v2114_v57  ;;  %v2130_v57 = vld [vmem:[%s3890_s9 + $0x4d0] sm:$0xff] }
  0xb5   : > { %880 = vmatpush.msra.mxu3 %v2113_v58  ;;  %v2090_v58 = vld [vmem:[%s3890_s9 + $0x3a8] sm:$0xff] }
  0xb7   : > { %v2926_v61 = vld.sshfl [vmem:[#allocation1] sm:$0xff pattern:$0x75316420]  ;;  %v2928_v62 = vld.sshfl [vmem:[#allocation1 + $0x8] sm:$0xff pattern:$0x75316420]  ;;  %881 = vmatpush.msra.mxu3 %v2112_v59 }
  0xb8   : > { %869 = vst [vmem:[#allocation1] ss:$2 sm:$0xff] %v2893_v45  ;;  %v2129_v59 = vld [vmem:[%s3890_s9 + $0x4c8] sm:$0xff] }
  0xb9   : > { %882 = vmatpush.msra.mxu3 %v2111_v60  ;;  %v2089_v60 = vld [vmem:[%s3890_s9 + $0x3a0] sm:$0xff] }
  0xbb   : > { %883 = vmatpush.msra.mxu3 %v2110_v63  ;;  %v2088_v63 = vld [vmem:[%s3890_s9 + $0x398] sm:$0xff] }
  0xbd   : > { %884 = vmatpush.msra.mxu3 %v2109_v0  ;;  %v2127_v0 = vld [vmem:[%s3890_s9 + $0x4b8] sm:$0xff] }
  0xbf   : > { %885 = vmatpush.msra.mxu3 %v2108_v1  ;;  %v870_v3 = vld.sshfl [vmem:[#allocation1] sm:$0xff pattern:$0x75316420]  ;;  %v2943_v4 = vld.sshfl [vmem:[#allocation1 + $0x8] sm:$0xff pattern:$0x75316420] }
  0xc0   : > { %977 = vst [vmem:[#allocation1] ss:$2 sm:$0xff] %v2893_v45  ;;  %v2087_v1 = vld [vmem:[%s3890_s9 + $0x390] sm:$0xff] }
  0xc1   : > { %886 = vmatpush.msra.mxu3 %v2107_v2  ;;  %v2126_v2 = vld [vmem:[%s3890_s9 + $0x4b0] sm:$0xff] }
  0xc3   : > { %887 = vmatpush.msra.mxu3 %v2106_v5  ;;  %v2125_v5 = vld [vmem:[%s3890_s9 + $0x4a8] sm:$0xff] }
  0xc5   : > { %888 = vmatpush.msra.mxu3 %v2105_v6  ;;  %v2085_v6 = vld [vmem:[%s3890_s9 + $0x380] sm:$0xff] }
  0xc7   : > { %889 = vmatpush.msra.mxu3 %v2104_v7  ;;  %v2955_v8 = vld.sshfl [vmem:[#allocation1] sm:$0xff pattern:$0x75316420]  ;;  %v2957_v9 = vld.sshfl [vmem:[#allocation1 + $0x8] sm:$0xff pattern:$0x75316420] }
  0xc8   : > { %890 = vmatmul.f32.vlgmr.msra.gmra.mxu3 %v870_v3  ;;  %1084 = vst [vmem:[#allocation1] ss:$2 sm:$0xff] %v2893_v45  ;;  %v2086_v3 = vld [vmem:[%s3890_s9 + $0x388] sm:$0xff]  ;;  %v2124_v7 = vld [vmem:[%s3890_s9 + $0x4a0] sm:$0xff] }
  0xcf   : > { %v2960_v10 = vld.sshfl [vmem:[#allocation1] sm:$0xff pattern:$0x75316420]  ;;  %v2962_v11 = vld.sshfl [vmem:[#allocation1 + $0x8] sm:$0xff pattern:$0x75316420] }
  0xd0   : > { %1191 = vst [vmem:[#allocation1] ss:$2 sm:$0xff] %v2893_v45 }
  0xd7   : > { %v2965_v12 = vld.sshfl [vmem:[#allocation1 + $0x8] sm:$0xff pattern:$0x75316420]  ;;  %v2967_v13 = vld.sshfl [vmem:[#allocation1] sm:$0xff pattern:$0x75316420] }
  0xd8   : > { %1298 = vst [vmem:[#allocation1] ss:$2 sm:$0xff] %v2893_v45  ;;  %v2069_v45 = vld [vmem:[%s3890_s9 + $0x300] sm:$0xff] }
 0x11d   : > { %v464_v14 = vpop.f32.mrf.mxu0  ;;  %v484_v15 = vpop.f32.mrf.mxu1 }
 0x11e   : > { %v485_v16 = vadd.f32 %v484_v15, %v464_v14  ;;  %v2154_v14 = vld [vmem:[%s3890_s9 + $0x578] sm:$0xff] }
 0x11f   : > { %v2123_v15 = vld [vmem:[%s3890_s9 + $0x498] sm:$0xff] }
 0x120   : > { %2032 = vmatpush.msk.msrb.mxu1 %vm572_vm0, %v485_v16  ;;  %v2153_v16 = vld [vmem:[%s3890_s9 + $0x570] sm:$0xff] }
 0x121   : > { %2033 = vmatmul.msk.f32.vlgmr.msrb.gmra.mxu1 %vm568_vm1, %v487_v18  ;;  %v2152_v18 = vld [vmem:[%s3890_s9 + $0x568] sm:$0xff] }
 0x122   : > { %767 = vmatpush.msra.mxu1 %v2084_v17  ;;  %v2122_v17 = vld [vmem:[%s3890_s9 + $0x490] sm:$0xff] }
 0x124   : > { %768 = vmatpush.msra.mxu1 %v2083_v19  ;;  %v2151_v19 = vld [vmem:[%s3890_s9 + $0x560] sm:$0xff] }
 0x126   : > { %769 = vmatpush.msra.mxu1 %v2082_v20  ;;  %v2120_v20 = vld [vmem:[%s3890_s9 + $0x480] sm:$0xff] }
 0x128   : > { %770 = vmatpush.msra.mxu1 %v2081_v21  ;;  %v2150_v21 = vld [vmem:[%s3890_s9 + $0x558] sm:$0xff] }
 0x12a   : > { %771 = vmatpush.msra.mxu1 %v2080_v22  ;;  %v2189_v22 = vld [vmem:[%s3890_s9 + $0x678] sm:$0xff] }
 0x12b   : > { %v543_v25 = vpop.f32.mrf.mxu2  ;;  %v563_v26 = vpop.f32.mrf.mxu3 }
 0x12c   : > { %772 = vmatpush.msra.mxu1 %v2079_v23  ;;  %v564_v27 = vadd.f32 %v563_v26, %v543_v25  ;;  %v2149_v23 = vld [vmem:[%s3890_s9 + $0x550] sm:$0xff]  ;;  %v2148_v25 = vld [vmem:[%s3890_s9 + $0x548] sm:$0xff] }
 0x12d   : > { %v2187_v26 = vld [vmem:[%s3890_s9 + $0x668] sm:$0xff] }
 0x12e   : > { %773 = vmatpush.msra.mxu1 %v2078_v24  ;;  %2030 = vmatpush.msk.msrb.mxu0 %vm572_vm0, %v564_v27  ;;  %v2188_v24 = vld [vmem:[%s3890_s9 + $0x670] sm:$0xff]  ;;  %v2147_v27 = vld [vmem:[%s3890_s9 + $0x540] sm:$0xff] }
 0x12f   : > { %2031 = vmatmul.msk.f32.vlgmr.msrb.gmra.mxu0 %vm568_vm1, %v2029_v29  ;;  %v2185_v29 = vld [vmem:[%s3890_s9 + $0x658] sm:$0xff] }
 0x130   : > { %774 = vmatpush.msra.mxu1 %v2077_v28  ;;  %v2146_v28 = vld [vmem:[%s3890_s9 + $0x538] sm:$0xff] }
 0x132   : > { %775 = vmatpush.msra.mxu1 %v2076_v30  ;;  %v2145_v30 = vld [vmem:[%s3890_s9 + $0x530] sm:$0xff] }
 0x133   : > { %v677_v33 = vpop.f32.mrf.mxu2  ;;  %v697_v34 = vpop.f32.mrf.mxu3 }
 0x134   : > { %776 = vmatpush.msra.mxu1 %v2075_v31  ;;  %v698_v35 = vadd.f32 %v697_v34, %v677_v33  ;;  %v2184_v31 = vld [vmem:[%s3890_s9 + $0x650] sm:$0xff]  ;;  %v2183_v33 = vld [vmem:[%s3890_s9 + $0x648] sm:$0xff]  ;;  %v2143_v34 = vld [vmem:[%s3890_s9 + $0x520] sm:$0xff] }
 0x136   : > { %777 = vmatpush.msra.mxu1 %v2074_v32  ;;  %2067 = vmatpush.msk.msra.mxu0 %vm572_vm0, %v698_v35  ;;  %v2144_v32 = vld [vmem:[%s3890_s9 + $0x528] sm:$0xff]  ;;  %v2182_v35 = vld [vmem:[%s3890_s9 + $0x640] sm:$0xff] }
 0x137   : > { %2068 = vmatmul.msk.f32.vlgmr.msra.gmra.mxu0 %vm568_vm1, %v2066_v38  ;;  %v2141_v38 = vld [vmem:[%s3890_s9 + $0x510] sm:$0xff] }
 0x138   : > { %778 = vmatpush.msra.mxu1 %v2073_v36  ;;  %787 = vmatpush.msrb.mxu0 %v2100_v37  ;;  %v2142_v36 = vld [vmem:[%s3890_s9 + $0x518] sm:$0xff] }
 0x139   : > { %v2181_v37 = vld [vmem:[%s3890_s9 + $0x638] sm:$0xff] }
 0x13a   : > { %779 = vmatpush.msra.mxu1 %v2072_v39  ;;  %788 = vmatpush.msrb.mxu0 %v2099_v40  ;;  %v2180_v39 = vld [vmem:[%s3890_s9 + $0x630] sm:$0xff]  ;;  %v2140_v40 = vld [vmem:[%s3890_s9 + $0x508] sm:$0xff] }
 0x13c   : > { %780 = vmatpush.msra.mxu1 %v2071_v41  ;;  %789 = vmatpush.msrb.mxu0 %v2098_v42  ;;  %v2179_v41 = vld [vmem:[%s3890_s9 + $0x628] sm:$0xff]  ;;  %v2139_v42 = vld [vmem:[%s3890_s9 + $0x500] sm:$0xff] }
 0x13e   : > { %781 = vmatpush.msra.mxu1 %v2070_v43  ;;  %790 = vmatpush.msrb.mxu0 %v2097_v44  ;;  %v2178_v43 = vld [vmem:[%s3890_s9 + $0x620] sm:$0xff]  ;;  %v2177_v44 = vld [vmem:[%s3890_s9 + $0x618] sm:$0xff] }
 0x140   : > { %782 = vmatpush.msra.mxu1 %v2069_v45  ;;  %791 = vmatpush.msrb.mxu0 %v2096_v46  ;;  %v2176_v45 = vld [vmem:[%s3890_s9 + $0x610] sm:$0xff]  ;;  %v2175_v46 = vld [vmem:[%s3890_s9 + $0x608] sm:$0xff] }
 0x141   : > { %783 = vmatmul.f32.vlgmr.msra.gmra.mxu1 %v2926_v61  ;;  %v2128_v61 = vld [vmem:[%s3890_s9 + $0x4c0] sm:$0xff] }
 0x142   : > { %894 = vmatpush.msrb.mxu1 %v2135_v47  ;;  %792 = vmatpush.msrb.mxu0 %v2095_v48  ;;  %v2174_v47 = vld [vmem:[%s3890_s9 + $0x600] sm:$0xff] }
 0x144   : > { %895 = vmatpush.msrb.mxu1 %v2134_v49  ;;  %793 = vmatpush.msrb.mxu0 %v2094_v50 }
 0x146   : > { %896 = vmatpush.msrb.mxu1 %v2133_v51  ;;  %794 = vmatpush.msrb.mxu0 %v2093_v52 }
 0x148   : > { %897 = vmatpush.msrb.mxu1 %v2132_v53  ;;  %795 = vmatpush.msrb.mxu0 %v2092_v54 }
 0x14a   : > { %898 = vmatpush.msrb.mxu1 %v2131_v55  ;;  %796 = vmatpush.msrb.mxu0 %v2091_v56  ;;  %v2101_v55 = vld [vmem:[%s3884_s3 + $0x18] sm:$0xff] }
 0x14b   : > { %v891_v56 = vpop.f32.mrf.mxu3 }
 0x14c   : > { %899 = vmatpush.msrb.mxu1 %v2130_v57  ;;  %797 = vmatpush.msrb.mxu0 %v2090_v58  ;;  %v2136_v58 = vld [vmem:[%s3884_s3 + $0x20] sm:$0xff] }
 0x14e   : > { %900 = vmatpush.msrb.mxu1 %v2129_v59  ;;  %798 = vmatpush.msrb.mxu0 %v2089_v60  ;;  %v2170_v59 = vld [vmem:[%s3890_s9 + $0x5f8] sm:$0xff]  ;;  %v2169_v60 = vld [vmem:[%s3890_s9 + $0x5f0] sm:$0xff] }
 0x150   : > { %901 = vmatpush.msrb.mxu1 %v2128_v61  ;;  %799 = vmatpush.msrb.mxu0 %v2088_v63  ;;  %v2168_v61 = vld [vmem:[%s3890_s9 + $0x5e8] sm:$0xff]  ;;  %v2167_v63 = vld [vmem:[%s3890_s9 + $0x5e0] sm:$0xff] }
 0x152   : > { %902 = vmatpush.msrb.mxu1 %v2127_v0  ;;  %800 = vmatpush.msrb.mxu0 %v2087_v1  ;;  %v2166_v0 = vld [vmem:[%s3890_s9 + $0x5d8] sm:$0xff]  ;;  %v2165_v1 = vld [vmem:[%s3890_s9 + $0x5d0] sm:$0xff] }
 0x154   : > { %903 = vmatpush.msrb.mxu1 %v2126_v2  ;;  %801 = vmatpush.msrb.mxu0 %v2086_v3  ;;  %v2164_v2 = vld [vmem:[%s3890_s9 + $0x5c8] sm:$0xff]  ;;  %v2163_v3 = vld [vmem:[%s3890_s9 + $0x5c0] sm:$0xff] }
 0x156   : > { %904 = vmatpush.msrb.mxu1 %v2125_v5  ;;  %802 = vmatpush.msrb.mxu0 %v2085_v6  ;;  %v2162_v5 = vld [vmem:[%s3890_s9 + $0x5b8] sm:$0xff]  ;;  %v2161_v6 = vld [vmem:[%s3890_s9 + $0x5b0] sm:$0xff] }
 0x157   : > { %803 = vmatmul.f32.vlgmr.msrb.gmra.mxu0 %v2928_v62  ;;  %v2121_v62 = vld [vmem:[%s3890_s9 + $0x488] sm:$0xff] }
 0x158   : > { %905 = vmatpush.msrb.mxu1 %v2124_v7  ;;  %982 = vmatpush.msra.mxu0 %v2154_v14  ;;  %v2160_v7 = vld [vmem:[%s3890_s9 + $0x5a8] sm:$0xff]  ;;  %v2159_v14 = vld [vmem:[%s3890_s9 + $0x5a0] sm:$0xff] }
 0x15a   : > { %906 = vmatpush.msrb.mxu1 %v2123_v15  ;;  %983 = vmatpush.msra.mxu0 %v2153_v16  ;;  %v2158_v15 = vld [vmem:[%s3890_s9 + $0x598] sm:$0xff]  ;;  %v2157_v16 = vld [vmem:[%s3890_s9 + $0x590] sm:$0xff] }
 0x15c   : > { %907 = vmatpush.msrb.mxu1 %v2122_v17  ;;  %984 = vmatpush.msra.mxu0 %v2152_v18  ;;  %v2156_v17 = vld [vmem:[%s3890_s9 + $0x588] sm:$0xff]  ;;  %v2155_v18 = vld [vmem:[%s3890_s9 + $0x580] sm:$0xff] }
 0x15e   : > { %908 = vmatpush.msrb.mxu1 %v2121_v62  ;;  %985 = vmatpush.msra.mxu0 %v2151_v19  ;;  %v2224_v62 = vld [vmem:[%s3890_s9 + $0x778] sm:$0xff]  ;;  %v2223_v19 = vld [vmem:[%s3890_s9 + $0x770] sm:$0xff] }
 0x160   : > { %909 = vmatpush.msrb.mxu1 %v2120_v20  ;;  %986 = vmatpush.msra.mxu0 %v2150_v21  ;;  %v2222_v20 = vld [vmem:[%s3890_s9 + $0x768] sm:$0xff]  ;;  %v2221_v21 = vld [vmem:[%s3890_s9 + $0x760] sm:$0xff] }
 0x161   : > { %910 = vmatmul.f32.vlgmr.msrb.gmra.mxu1 %v2943_v4  ;;  %v2186_v4 = vld [vmem:[%s3890_s9 + $0x660] sm:$0xff] }
 0x162   : > { %1089 = vmatpush.msra.mxu1 %v2189_v22  ;;  %987 = vmatpush.msra.mxu0 %v2149_v23  ;;  %v2220_v22 = vld [vmem:[%s3890_s9 + $0x758] sm:$0xff]  ;;  %v2218_v23 = vld [vmem:[%s3890_s9 + $0x748] sm:$0xff] }
 0x164   : > { %1090 = vmatpush.msra.mxu1 %v2188_v24  ;;  %988 = vmatpush.msra.mxu0 %v2148_v25  ;;  %v2217_v24 = vld [vmem:[%s3890_s9 + $0x740] sm:$0xff]  ;;  %v2216_v25 = vld [vmem:[%s3890_s9 + $0x738] sm:$0xff] }
 0x166   : > { %1091 = vmatpush.msra.mxu1 %v2187_v26  ;;  %989 = vmatpush.msra.mxu0 %v2147_v27  ;;  %v2215_v26 = vld [vmem:[%s3890_s9 + $0x730] sm:$0xff]  ;;  %v2214_v27 = vld [vmem:[%s3890_s9 + $0x728] sm:$0xff] }
 0x168   : > { %1092 = vmatpush.msra.mxu1 %v2186_v4  ;;  %990 = vmatpush.msra.mxu0 %v2146_v28  ;;  %v2213_v4 = vld [vmem:[%s3890_s9 + $0x720] sm:$0xff]  ;;  %v2212_v28 = vld [vmem:[%s3890_s9 + $0x718] sm:$0xff] }
 0x16a   : > { %1093 = vmatpush.msra.mxu1 %v2185_v29  ;;  %991 = vmatpush.msra.mxu0 %v2145_v30  ;;  %v2211_v29 = vld [vmem:[%s3890_s9 + $0x710] sm:$0xff]  ;;  %v2210_v30 = vld [vmem:[%s3890_s9 + $0x708] sm:$0xff] }
 0x16c   : > { %1094 = vmatpush.msra.mxu1 %v2184_v31  ;;  %992 = vmatpush.msra.mxu0 %v2144_v32  ;;  %v2209_v31 = vld [vmem:[%s3890_s9 + $0x700] sm:$0xff] }
 0x16e   : > { %1095 = vmatpush.msra.mxu1 %v2183_v33  ;;  %993 = vmatpush.msra.mxu0 %v2143_v34 }
 0x170   : > { %1096 = vmatpush.msra.mxu1 %v2182_v35  ;;  %994 = vmatpush.msra.mxu0 %v2142_v36 }
 0x172   : > { %1097 = vmatpush.msra.mxu1 %v2181_v37  ;;  %995 = vmatpush.msra.mxu0 %v2141_v38 }
 0x174   : > { %1098 = vmatpush.msra.mxu1 %v2180_v39  ;;  %996 = vmatpush.msra.mxu0 %v2140_v40  ;;  %v2171_v39 = vld [vmem:[%s3884_s3 + $0x28] sm:$0xff]  ;;  %v2205_v40 = vld [vmem:[%s3890_s9 + $0x6f8] sm:$0xff] }
 0x176   : > { %1099 = vmatpush.msra.mxu1 %v2179_v41  ;;  %997 = vmatpush.msra.mxu0 %v2139_v42  ;;  %v2203_v41 = vld [vmem:[%s3890_s9 + $0x6e8] sm:$0xff]  ;;  %v2202_v42 = vld [vmem:[%s3890_s9 + $0x6e0] sm:$0xff] }
 0x177   : > { %998 = vmatmul.f32.vlgmr.msra.gmra.mxu0 %v2955_v8 }
 0x178   : > { %1100 = vmatpush.msra.mxu1 %v2178_v43  ;;  %v2201_v43 = vld [vmem:[%s3890_s9 + $0x6d8] sm:$0xff] }
 0x17a   : > { %1101 = vmatpush.msra.mxu1 %v2177_v44  ;;  %v2200_v44 = vld [vmem:[%s3890_s9 + $0x6d0] sm:$0xff] }
 0x17c   : > { %1102 = vmatpush.msra.mxu1 %v2176_v45  ;;  %v2199_v45 = vld [vmem:[%s3890_s9 + $0x6c8] sm:$0xff] }
 0x17e   : > { %1103 = vmatpush.msra.mxu1 %v2175_v46  ;;  %v2198_v46 = vld [vmem:[%s3890_s9 + $0x6c0] sm:$0xff] }
 0x180   : > { %1104 = vmatpush.msra.mxu1 %v2174_v47  ;;  %v2197_v47 = vld [vmem:[%s3890_s9 + $0x6b8] sm:$0xff] }
 0x181   : > { %1105 = vmatmul.f32.vlgmr.msra.gmra.mxu1 %v2960_v10 }
 0x19e   : > { %v619_v8 = vpop.f32.mrf.mxu1 }
 0x1ac   : > { %v593_v48 = vpop.f32.mrf.mxu0 }
 0x1ad   : > { %v620_v49 = vadd.f32 %v619_v8, %v593_v48  ;;  %v2196_v8 = vld [vmem:[%s3890_s9 + $0x6b0] sm:$0xff]  ;;  %v2195_v48 = vld [vmem:[%s3890_s9 + $0x6a8] sm:$0xff] }
 0x1b4   : > { %v725_v50 = vpop.f32.mrf.mxu0 }
 0x1b5   : > { %v3230_v51 = vadd.f32 %v725_v50, %v620_v49  ;;  %v2194_v49 = vld [vmem:[%s3890_s9 + $0x6a0] sm:$0xff]  ;;  %v2193_v50 = vld [vmem:[%s3890_s9 + $0x698] sm:$0xff] }
 0x1be   : > { %v784_v52 = vpop.f32.mrf.mxu1 }
 0x1d4   : > { %v804_v53 = vpop.f32.mrf.mxu0 }
 0x1d5   : > { %v805_v54 = vadd.f32 %v804_v53, %v784_v52  ;;  %v2191_v52 = vld [vmem:[%s3890_s9 + $0x688] sm:$0xff]  ;;  %v2190_v53 = vld [vmem:[%s3890_s9 + $0x680] sm:$0xff] }
 0x1d7   : > { %2102 = vmatpush.msk.msra.mxu2 %vm572_vm0, %v805_v54  ;;  %v2259_v54 = vld [vmem:[%s3890_s9 + $0x878] sm:$0xff] }
 0x1d8   : > { %2103 = vmatmul.msk.f32.vlgmr.msra.gmra.mxu2 %vm568_vm1, %v2101_v55  ;;  %v2258_v55 = vld [vmem:[%s3890_s9 + $0x870] sm:$0xff] }
 0x1de   : > { %v911_v57 = vpop.f32.mrf.mxu1 }
 0x1df   : > { %v3237_v10 = vadd.f32 %v911_v57, %v891_v56  ;;  %v2257_v56 = vld [vmem:[%s3890_s9 + $0x868] sm:$0xff]  ;;  %v2256_v57 = vld [vmem:[%s3890_s9 + $0x860] sm:$0xff] }
 0x1e1   : > { %2137 = vmatpush.msk.msrb.mxu2 %vm572_vm0, %v3237_v10 }
 0x1e2   : > { %2138 = vmatmul.msk.f32.vlgmr.msrb.gmra.mxu2 %vm568_vm1, %v2136_v58  ;;  %v2255_v58 = vld [vmem:[%s3890_s9 + $0x858] sm:$0xff] }
 0x1e3   : > { %1002 = vmatpush.msra.mxu2 %v2170_v59  ;;  %v2253_v59 = vld [vmem:[%s3890_s9 + $0x848] sm:$0xff] }
 0x1e5   : > { %1003 = vmatpush.msra.mxu2 %v2169_v60  ;;  %v2252_v60 = vld [vmem:[%s3890_s9 + $0x840] sm:$0xff] }
 0x1e7   : > { %1004 = vmatpush.msra.mxu2 %v2168_v61  ;;  %v2251_v61 = vld [vmem:[%s3890_s9 + $0x838] sm:$0xff] }
 0x1e9   : > { %1005 = vmatpush.msra.mxu2 %v2167_v63  ;;  %v2250_v63 = vld [vmem:[%s3890_s9 + $0x830] sm:$0xff] }
 0x1eb   : > { %1006 = vmatpush.msra.mxu2 %v2166_v0  ;;  %v2249_v0 = vld [vmem:[%s3890_s9 + $0x828] sm:$0xff] }
 0x1ed   : > { %1007 = vmatpush.msra.mxu2 %v2165_v1  ;;  %v2248_v1 = vld [vmem:[%s3890_s9 + $0x820] sm:$0xff] }
 0x1ef   : > { %1008 = vmatpush.msra.mxu2 %v2164_v2  ;;  %v2247_v2 = vld [vmem:[%s3890_s9 + $0x818] sm:$0xff] }
 0x1f1   : > { %1009 = vmatpush.msra.mxu2 %v2163_v3  ;;  %v2246_v3 = vld [vmem:[%s3890_s9 + $0x810] sm:$0xff] }
 0x1f3   : > { %1010 = vmatpush.msra.mxu2 %v2162_v5  ;;  %v2245_v5 = vld [vmem:[%s3890_s9 + $0x808] sm:$0xff] }
 0x1f4   : > { %v999_v36 = vpop.f32.mrf.mxu0 }
 0x1f5   : > { %1011 = vmatpush.msra.mxu2 %v2161_v6  ;;  %v2244_v6 = vld [vmem:[%s3890_s9 + $0x800] sm:$0xff] }
 0x1f7   : > { %1012 = vmatpush.msra.mxu2 %v2160_v7  ;;  %v1299_v7 = vld.sshfl [vmem:[#allocation1] sm:$0xff pattern:$0x75316420] }
 0x1f9   : > { %1013 = vmatpush.msra.mxu2 %v2159_v14 }
 0x1fb   : > { %1014 = vmatpush.msra.mxu2 %v2158_v15 }
 0x1fd   : > { %1015 = vmatpush.msra.mxu2 %v2157_v16 }
 0x1fe   : > { %v1106_v16 = vpop.f32.mrf.mxu1 }
 0x1ff   : > { %1016 = vmatpush.msra.mxu2 %v2156_v17 }
 0x201   : > { %1017 = vmatpush.msra.mxu2 %v2155_v18 }
 0x202   : > { %1018 = vmatmul.f32.vlgmr.msra.gmra.mxu2 %v2957_v9  ;;  %v2219_v9 = vld [vmem:[%s3890_s9 + $0x750] sm:$0xff] }
 0x203   : > { %1196 = vmatpush.msrb.mxu2 %v2224_v62  ;;  %v2206_v62 = vld [vmem:[%s3884_s3 + $0x30] sm:$0xff] }
 0x205   : > { %1197 = vmatpush.msrb.mxu2 %v2223_v19  ;;  %v2240_v19 = vld [vmem:[%s3890_s9 + $0x7f8] sm:$0xff] }
 0x207   : > { %1198 = vmatpush.msrb.mxu2 %v2222_v20  ;;  %v2239_v20 = vld [vmem:[%s3890_s9 + $0x7f0] sm:$0xff] }
 0x209   : > { %1199 = vmatpush.msrb.mxu2 %v2221_v21  ;;  %v2238_v21 = vld [vmem:[%s3890_s9 + $0x7e8] sm:$0xff] }
 0x20b   : > { %1200 = vmatpush.msrb.mxu2 %v2220_v22  ;;  %v2237_v22 = vld [vmem:[%s3890_s9 + $0x7e0] sm:$0xff] }
 0x20d   : > { %1201 = vmatpush.msrb.mxu2 %v2219_v9  ;;  %v2236_v9 = vld [vmem:[%s3890_s9 + $0x7d8] sm:$0xff] }
 0x20f   : > { %1202 = vmatpush.msrb.mxu2 %v2218_v23  ;;  %v2235_v23 = vld [vmem:[%s3890_s9 + $0x7d0] sm:$0xff] }
 0x211   : > { %1203 = vmatpush.msrb.mxu2 %v2217_v24  ;;  %v2234_v24 = vld [vmem:[%s3890_s9 + $0x7c8] sm:$0xff] }
 0x213   : > { %1204 = vmatpush.msrb.mxu2 %v2216_v25  ;;  %v2233_v25 = vld [vmem:[%s3890_s9 + $0x7c0] sm:$0xff] }
 0x215   : > { %1205 = vmatpush.msrb.mxu2 %v2215_v26  ;;  %v2232_v26 = vld [vmem:[%s3890_s9 + $0x7b8] sm:$0xff] }
 0x217   : > { %1206 = vmatpush.msrb.mxu2 %v2214_v27  ;;  %v2231_v27 = vld [vmem:[%s3890_s9 + $0x7b0] sm:$0xff] }
 0x219   : > { %1207 = vmatpush.msrb.mxu2 %v2213_v4  ;;  %v2230_v4 = vld [vmem:[%s3890_s9 + $0x7a8] sm:$0xff] }
 0x21b   : > { %1208 = vmatpush.msrb.mxu2 %v2212_v28  ;;  %v2229_v28 = vld [vmem:[%s3890_s9 + $0x7a0] sm:$0xff] }
 0x21d   : > { %1209 = vmatpush.msrb.mxu2 %v2211_v29  ;;  %v2228_v29 = vld [vmem:[%s3890_s9 + $0x798] sm:$0xff] }
 0x21f   : > { %1210 = vmatpush.msrb.mxu2 %v2210_v30  ;;  %v2227_v30 = vld [vmem:[%s3890_s9 + $0x790] sm:$0xff] }
 0x221   : > { %1211 = vmatpush.msrb.mxu2 %v2209_v31  ;;  %v2226_v31 = vld [vmem:[%s3890_s9 + $0x788] sm:$0xff] }
 0x222   : > { %1212 = vmatmul.f32.vlgmr.msrb.gmra.mxu2 %v2967_v13  ;;  %v2204_v13 = vld [vmem:[%s3890_s9 + $0x6f0] sm:$0xff] }
 0x25b   : > { %v832_v32 = vpop.f32.mrf.mxu2 }
 0x25c   : > { %v835_v33 = vadd.f32 %v832_v32, %v3230_v51  ;;  %v2192_v51 = vld [vmem:[%s3890_s9 + $0x690] sm:$0xff]  ;;  %v2225_v32 = vld [vmem:[%s3890_s9 + $0x780] sm:$0xff] }
 0x265   : > { %v939_v34 = vpop.f32.mrf.mxu2 }
 0x266   : > { %v3344_v35 = vadd.f32 %v939_v34, %v835_v33 }
 0x285   : > { %v1019_v37 = vpop.f32.mrf.mxu2 }
 0x286   : > { %v1020_v38 = vadd.f32 %v1019_v37, %v999_v36 }
 0x288   : > { %2172 = vmatpush.msk.msrb.mxu3 %vm572_vm0, %v1020_v38  ;;  %v2241_v38 = vld [vmem:[%s3884_s3 + $0x38] sm:$0xff] }
 0x289   : > { %2173 = vmatmul.msk.f32.vlgmr.msrb.gmra.mxu3 %vm568_vm1, %v2171_v39  ;;  %v2275_v39 = vld [vmem:[%s3890_s9 + $0x8f8] sm:$0xff] }
 0x28a   : > { %1109 = vmatpush.msra.mxu3 %v2205_v40  ;;  %v2273_v40 = vld [vmem:[%s3890_s9 + $0x8e8] sm:$0xff] }
 0x28c   : > { %1110 = vmatpush.msra.mxu3 %v2204_v13  ;;  %v2272_v13 = vld [vmem:[%s3890_s9 + $0x8e0] sm:$0xff] }
 0x28e   : > { %1111 = vmatpush.msra.mxu3 %v2203_v41  ;;  %v2271_v41 = vld [vmem:[%s3890_s9 + $0x8d8] sm:$0xff] }
 0x290   : > { %1112 = vmatpush.msra.mxu3 %v2202_v42  ;;  %v2270_v42 = vld [vmem:[%s3890_s9 + $0x8d0] sm:$0xff] }
 0x292   : > { %1113 = vmatpush.msra.mxu3 %v2201_v43  ;;  %v2269_v43 = vld [vmem:[%s3890_s9 + $0x8c8] sm:$0xff] }
 0x294   : > { %1114 = vmatpush.msra.mxu3 %v2200_v44  ;;  %v2268_v44 = vld [vmem:[%s3890_s9 + $0x8c0] sm:$0xff] }
 0x296   : > { %1115 = vmatpush.msra.mxu3 %v2199_v45  ;;  %v2267_v45 = vld [vmem:[%s3890_s9 + $0x8b8] sm:$0xff] }
 0x298   : > { %1116 = vmatpush.msra.mxu3 %v2198_v46  ;;  %v2266_v46 = vld [vmem:[%s3890_s9 + $0x8b0] sm:$0xff] }
 0x29a   : > { %1117 = vmatpush.msra.mxu3 %v2197_v47  ;;  %v2265_v47 = vld [vmem:[%s3890_s9 + $0x8a8] sm:$0xff] }
 0x29c   : > { %1118 = vmatpush.msra.mxu3 %v2196_v8  ;;  %v2264_v8 = vld [vmem:[%s3890_s9 + $0x8a0] sm:$0xff] }
 0x29e   : > { %1119 = vmatpush.msra.mxu3 %v2195_v48  ;;  %v2263_v48 = vld [vmem:[%s3890_s9 + $0x898] sm:$0xff] }
 0x2a0   : > { %1120 = vmatpush.msra.mxu3 %v2194_v49  ;;  %v2262_v49 = vld [vmem:[%s3890_s9 + $0x890] sm:$0xff] }
 0x2a2   : > { %1121 = vmatpush.msra.mxu3 %v2193_v50  ;;  %v2261_v50 = vld [vmem:[%s3890_s9 + $0x888] sm:$0xff] }
 0x2a4   : > { %1122 = vmatpush.msra.mxu3 %v2192_v51  ;;  %v2260_v51 = vld [vmem:[%s3890_s9 + $0x880] sm:$0xff] }
 0x2a6   : > { %1123 = vmatpush.msra.mxu3 %v2191_v52  ;;  %v1300_v52 = vld.sshfl [vmem:[#allocation1 + $0x8] sm:$0xff pattern:$0x75316420] }
 0x2a8   : > { %1124 = vmatpush.msra.mxu3 %v2190_v53 }
 0x2a9   : > { %1125 = vmatmul.f32.vlgmr.msra.gmra.mxu3 %v2962_v11  ;;  %v2254_v11 = vld [vmem:[%s3890_s9 + $0x850] sm:$0xff] }
 0x2aa   : > { %1303 = vmatpush.msrb.mxu3 %v2259_v54 }
 0x2ac   : > { %1304 = vmatpush.msrb.mxu3 %v2258_v55  ;;  %v1372_v55 = vld [vmem:[%s3885_s4] sm:$0xff] }
 0x2ad   : > { %1375 = vperm.xlu1 %2418, %v1372_v55   ;;  %v2345_v55 = vld [vmem:[%s3891_s10 + $0x1b8] sm:$0xff] }
 0x2ae   : > { %1305 = vmatpush.msrb.mxu3 %v2257_v56  ;;  %v1394_v56 = vld [vmem:[%s3891_s10 + $0x38] sm:$0xff] }
 0x2b0   : > { %1306 = vmatpush.msrb.mxu3 %v2256_v57  ;;  %v1379_v57 = vld [vmem:[%s3886_s5] sm:$0xff] }
 0x2b2   : > { %1307 = vmatpush.msrb.mxu3 %v2255_v58 }
 0x2b4   : > { %1308 = vmatpush.msrb.mxu3 %v2254_v11 }
 0x2b5   : > { %1382 = vperm.xlu1 %2418, %v1379_v57   ;;  %v2325_v57 = vld [vmem:[%s3888_s7 + $0x20] sm:$0xff] }
 0x2b6   : > { %1309 = vmatpush.msrb.mxu3 %v2253_v59 }
 0x2b8   : > { %1310 = vmatpush.msrb.mxu3 %v2252_v60  ;;  %v2276_v60 = vld [vmem:[%s3884_s3 + $0x40] sm:$0xff] }
 0x2ba   : > { %1311 = vmatpush.msrb.mxu3 %v2251_v61  ;;  %v1393_v61 = vld [vmem:[%s3891_s10 + $0x30] sm:$0xff] }
 0x2bc   : > { %1312 = vmatpush.msrb.mxu3 %v2250_v63  ;;  %v1392_v63 = vld [vmem:[%s3891_s10 + $0x28] sm:$0xff] }
 0x2be   : > { %1313 = vmatpush.msrb.mxu3 %v2249_v0  ;;  %v2301_v0 = vld [vmem:[%s3891_s10 + $0xb8] sm:$0xff] }
 0x2c0   : > { %1314 = vmatpush.msrb.mxu3 %v2248_v1  ;;  %v1391_v1 = vld [vmem:[%s3891_s10 + $0x20] sm:$0xff] }
 0x2c2   : > { %1315 = vmatpush.msrb.mxu3 %v2247_v2  ;;  %v1390_v2 = vld [vmem:[%s3891_s10 + $0x18] sm:$0xff] }
 0x2c4   : > { %1316 = vmatpush.msrb.mxu3 %v2246_v3  ;;  %v2300_v3 = vld [vmem:[%s3891_s10 + $0xb0] sm:$0xff] }
 0x2c6   : > { %1317 = vmatpush.msrb.mxu3 %v2245_v5  ;;  %v1389_v5 = vld [vmem:[%s3891_s10 + $0x10] sm:$0xff] }
 0x2c8   : > { %1318 = vmatpush.msrb.mxu3 %v2244_v6  ;;  %v2299_v6 = vld [vmem:[%s3891_s10 + $0xa8] sm:$0xff] }
 0x2c9   : > { %1319 = vmatmul.f32.vlgmr.msrb.gmra.mxu3 %v1299_v7  ;;  %v1388_v7 = vld [vmem:[%s3891_s10 + $0x8] sm:$0xff] }
 0x2ca   : > { %1539 = vmatpush.msra.mxu3 %v2301_v0  ;;  %v2341_v0 = vld [vmem:[%s3891_s10 + $0x198] sm:$0xff] }
 0x2cc   : > { %1540 = vmatpush.msra.mxu3 %v2300_v3  ;;  %v2334_v3 = vld [vmem:[%s3891_s10 + $0x178] sm:$0xff] }
 0x2ce   : > { %1541 = vmatpush.msra.mxu3 %v2299_v6  ;;  %v2333_v6 = vld [vmem:[%s3891_s10 + $0x170] sm:$0xff] }
 0x30c   : > { %v1047_v14 = vpop.f32.mrf.mxu3 }
 0x30d   : > { %v1050_v15 = vadd.f32 %v1047_v14, %v3344_v35  ;;  %v1213_v35 = vpop.f32.mrf.mxu2  ;;  %v2298_v14 = vld [vmem:[%s3891_s10 + $0xa0] sm:$0xff] }
 0x30e   : > { %1542 = vmatpush.msra.mxu3 %v2298_v14  ;;  %v2332_v14 = vld [vmem:[%s3891_s10 + $0x168] sm:$0xff] }
 0x32c   : > { %v1126_v17 = vpop.f32.mrf.mxu3 }
 0x32d   : > { %v1127_v18 = vadd.f32 %v1126_v17, %v1106_v16  ;;  %v2290_v16 = vld [vmem:[%s3891_s10 + $0x78] sm:$0xff] }
 0x32e   : > { %v2297_v17 = vld [vmem:[%s3891_s10 + $0x98] sm:$0xff] }
 0x32f   : > { %2207 = vmatpush.msk.msrb.mxu0 %vm572_vm0, %v1127_v18  ;;  %1543 = vmatpush.msra.mxu3 %v2297_v17  ;;  %v2289_v18 = vld [vmem:[%s3891_s10 + $0x70] sm:$0xff]  ;;  %v2330_v17 = vld [vmem:[%s3891_s10 + $0x158] sm:$0xff] }
 0x330   : > { %2208 = vmatmul.msk.f32.vlgmr.msrb.gmra.mxu0 %vm568_vm1, %v2206_v62  ;;  %v2296_v62 = vld [vmem:[%s3891_s10 + $0x90] sm:$0xff] }
 0x331   : > { %1216 = vmatpush.msra.mxu0 %v2240_v19  ;;  %1544 = vmatpush.msra.mxu3 %v2296_v62  ;;  %v2288_v19 = vld [vmem:[%s3891_s10 + $0x68] sm:$0xff] }
 0x332   : > { %v2328_v62 = vld [vmem:[%s3891_s10 + $0x148] sm:$0xff] }
 0x333   : > { %1217 = vmatpush.msra.mxu0 %v2239_v20  ;;  %v2295_v20 = vld [vmem:[%s3891_s10 + $0x88] sm:$0xff] }
 0x334   : > { %1545 = vmatpush.msra.mxu3 %v2295_v20 }
 0x335   : > { %1218 = vmatpush.msra.mxu0 %v2238_v21  ;;  %v2287_v21 = vld [vmem:[%s3891_s10 + $0x60] sm:$0xff] }
 0x337   : > { %1219 = vmatpush.msra.mxu0 %v2237_v22  ;;  %v2294_v22 = vld [vmem:[%s3891_s10 + $0x80] sm:$0xff] }
 0x338   : > { %1546 = vmatpush.msra.mxu3 %v2294_v22 }
 0x339   : > { %1220 = vmatpush.msra.mxu0 %v2236_v9  ;;  %v2286_v9 = vld [vmem:[%s3891_s10 + $0x58] sm:$0xff] }
 0x33b   : > { %1221 = vmatpush.msra.mxu0 %v2235_v23  ;;  %v2285_v23 = vld [vmem:[%s3891_s10 + $0x50] sm:$0xff] }
 0x33d   : > { %1222 = vmatpush.msra.mxu0 %v2234_v24  ;;  %v2284_v24 = vld [vmem:[%s3891_s10 + $0x48] sm:$0xff] }
 0x33f   : > { %1223 = vmatpush.msra.mxu0 %v2233_v25  ;;  %v2283_v25 = vld [vmem:[%s3891_s10 + $0x40] sm:$0xff] }
 0x341   : > { %1224 = vmatpush.msra.mxu0 %v2232_v26  ;;  %v1376_v26 = vpop.permute.xlu1 %1375 }
 0x343   : > { %1225 = vmatpush.msra.mxu0 %v2231_v27 }
 0x345   : > { %1226 = vmatpush.msra.mxu0 %v2230_v4 }
 0x347   : > { %1227 = vmatpush.msra.mxu0 %v2229_v28 }
 0x349   : > { %1228 = vmatpush.msra.mxu0 %v2228_v29  ;;  %v1383_v29 = vpop.permute.xlu1 %1382 }
 0x34b   : > { %1229 = vmatpush.msra.mxu0 %v2227_v30 }
 0x34c   : > { %v1320_v58 = vpop.f32.mrf.mxu3 }
 0x34d   : > { %1230 = vmatpush.msra.mxu0 %v2226_v31 }
 0x34f   : > { %1231 = vmatpush.msra.mxu0 %v2225_v32  ;;  %v1419_v32 = vld [vmem:[%s3888_s7] sm:$0xff] }
 0x350   : > { %1232 = vmatmul.f32.vlgmr.msra.gmra.mxu0 %v2965_v12  ;;  %v2274_v12 = vld [vmem:[%s3890_s9 + $0x8f0] sm:$0xff] }
 0x351   : > { %1407 = vmatpush.msrb.mxu0 %v1394_v56 }
 0x353   : > { %1408 = vmatpush.msrb.mxu0 %v1393_v61 }
 0x355   : > { %1409 = vmatpush.msrb.mxu0 %v1392_v63  ;;  %v2342_v63 = vld [vmem:[%s3891_s10 + $0x1a0] sm:$0xff] }
 0x357   : > { %1410 = vmatpush.msrb.mxu0 %v1391_v1  ;;  %v2314_v1 = vld [vmem:[%s3888_s7 + $0x18] sm:$0xff] }
 0x359   : > { %1411 = vmatpush.msrb.mxu0 %v1390_v2 }
 0x35b   : > { %1412 = vmatpush.msrb.mxu0 %v1389_v5  ;;  %v2340_v5 = vld [vmem:[%s3891_s10 + $0x190] sm:$0xff] }
 0x35d   : > { %1413 = vmatpush.msrb.mxu0 %v1388_v7  ;;  %v2339_v7 = vld [vmem:[%s3891_s10 + $0x188] sm:$0xff] }
 0x3ad   : > { %v1154_v33 = vpop.f32.mrf.mxu0 }
 0x3ae   : > { %v1157_v34 = vadd.f32 %v1154_v33, %v1050_v15  ;;  %v1387_v15 = vld [vmem:[%s3891_s10] sm:$0xff] }
 0x3af   : > { %1414 = vmatpush.msrb.mxu0 %v1387_v15  ;;  %v2338_v15 = vld [vmem:[%s3891_s10 + $0x180] sm:$0xff] }
 0x3b1   : > { %1484 = vmatpush.msra.mxu0 %v2290_v16  ;;  %v2331_v16 = vld [vmem:[%s3891_s10 + $0x160] sm:$0xff] }
 0x3b3   : > { %1485 = vmatpush.msra.mxu0 %v2289_v18  ;;  %v2329_v18 = vld [vmem:[%s3891_s10 + $0x150] sm:$0xff] }
 0x3b5   : > { %1486 = vmatpush.msra.mxu0 %v2288_v19  ;;  %v2327_v19 = vld [vmem:[%s3891_s10 + $0x140] sm:$0xff] }
 0x3b7   : > { %1487 = vmatpush.msra.mxu0 %v2287_v21 }
 0x3b9   : > { %1488 = vmatpush.msra.mxu0 %v2286_v9 }
 0x3bb   : > { %1489 = vmatpush.msra.mxu0 %v2285_v23  ;;  %v2367_v23 = vld [vmem:[%s3891_s10 + $0x238] sm:$0xff] }
 0x3bd   : > { %1490 = vmatpush.msra.mxu0 %v2284_v24 }
 0x3bf   : > { %1491 = vmatpush.msra.mxu0 %v2283_v25  ;;  %v2347_v25 = vld [vmem:[%s3888_s7 + $0x30] sm:$0xff] }
 0x3cd   : > { %v1233_v36 = vpop.f32.mrf.mxu0 }
 0x3ce   : > { %v1234_v37 = vadd.f32 %v1233_v36, %v1213_v35  ;;  %v2303_v36 = vld [vmem:[%s3888_s7 + $0x10] sm:$0xff] }
 0x3d0   : > { %2242 = vmatpush.msk.msrb.mxu1 %vm572_vm0, %v1234_v37  ;;  %v943_v37 = vld [vmem:[%s3887_s6] sm:$0xff] }
 0x3d1   : > { %2243 = vmatmul.msk.f32.vlgmr.msrb.gmra.mxu1 %vm568_vm1, %v2241_v38  ;;  %v2322_v38 = vld [vmem:[%s3891_s10 + $0x130] sm:$0xff] }
 0x3d2   : > { %1323 = vmatpush.msra.mxu1 %v2275_v39 }
 0x3d4   : > { %1324 = vmatpush.msra.mxu1 %v2274_v12  ;;  %v2321_v12 = vld [vmem:[%s3891_s10 + $0x128] sm:$0xff] }
 0x3d6   : > { %1325 = vmatpush.msra.mxu1 %v2273_v40  ;;  %v2311_v40 = vld [vmem:[%s3891_s10 + $0xf0] sm:$0xff] }
 0x3d8   : > { %1326 = vmatpush.msra.mxu1 %v2272_v13  ;;  %v2320_v13 = vld [vmem:[%s3891_s10 + $0x120] sm:$0xff] }
 0x3da   : > { %1327 = vmatpush.msra.mxu1 %v2271_v41  ;;  %v2310_v41 = vld [vmem:[%s3891_s10 + $0xe8] sm:$0xff] }
 0x3dc   : > { %1328 = vmatpush.msra.mxu1 %v2270_v42  ;;  %v2319_v42 = vld [vmem:[%s3891_s10 + $0x118] sm:$0xff] }
 0x3de   : > { %1329 = vmatpush.msra.mxu1 %v2269_v43  ;;  %v2309_v43 = vld [vmem:[%s3891_s10 + $0xe0] sm:$0xff] }
 0x3e0   : > { %1330 = vmatpush.msra.mxu1 %v2268_v44  ;;  %v2292_v44 = vld [vmem:[%s3888_s7 + $0x8] sm:$0xff] }
 0x3e2   : > { %1331 = vmatpush.msra.mxu1 %v2267_v45  ;;  %v2318_v45 = vld [vmem:[%s3891_s10 + $0x110] sm:$0xff] }
 0x3e4   : > { %1332 = vmatpush.msra.mxu1 %v2266_v46  ;;  %v2308_v46 = vld [vmem:[%s3891_s10 + $0xd8] sm:$0xff] }
 0x3e6   : > { %1333 = vmatpush.msra.mxu1 %v2265_v47  ;;  %v2317_v47 = vld [vmem:[%s3891_s10 + $0x108] sm:$0xff] }
 0x3e8   : > { %1334 = vmatpush.msra.mxu1 %v2264_v8  ;;  %v2307_v8 = vld [vmem:[%s3891_s10 + $0xd0] sm:$0xff] }
 0x3ea   : > { %1335 = vmatpush.msra.mxu1 %v2263_v48  ;;  %v2316_v48 = vld [vmem:[%s3891_s10 + $0x100] sm:$0xff] }
 0x3ec   : > { %1336 = vmatpush.msra.mxu1 %v2262_v49  ;;  %v2306_v49 = vld [vmem:[%s3891_s10 + $0xc8] sm:$0xff] }
 0x3ee   : > { %1337 = vmatpush.msra.mxu1 %v2261_v50  ;;  %v2305_v50 = vld [vmem:[%s3891_s10 + $0xc0] sm:$0xff] }
 0x3f0   : > { %1338 = vmatpush.msra.mxu1 %v2260_v51 }
 0x3f1   : > { %1339 = vmatmul.f32.vlgmr.msra.gmra.mxu1 %v1300_v52 }
 0x44e   : > { %v1261_v53 = vpop.f32.mrf.mxu1 }
 0x44f   : > { %v1264_v54 = vadd.f32 %v1261_v53, %v1157_v34  ;;  %v2323_v34 = vld [vmem:[%s3891_s10 + $0x138] sm:$0xff] }
 0x46e   : > { %v1340_v11 = vpop.f32.mrf.mxu1 }
 0x46f   : > { %v1341_v59 = vadd.f32 %v1340_v11, %v1320_v58  ;;  %v2344_v11 = vld [vmem:[%s3891_s10 + $0x1b0] sm:$0xff] }
 0x471   : > { %2277 = vmatpush.msk.msra.mxu2 %vm572_vm0, %v1341_v59 }
 0x472   : > { %2278 = vmatmul.msk.f32.vlgmr.msra.gmra.mxu2 %vm568_vm1, %v2276_v60  ;;  %v2343_v60 = vld [vmem:[%s3891_s10 + $0x1a8] sm:$0xff] }
 0x4f5   : > { %v1368_v27 = vpop.f32.mrf.mxu2 }
 0x4f6   : > { %v1371_v4 = vadd.f32 %v1368_v27, %v1264_v54  ;;  %v2336_v27 = vld [vmem:[%s3888_s7 + $0x28] sm:$0xff] }
 0x4f8   : > { %v1378_v28 = vmul.f32 %v1376_v26, %v1371_v4  ;;  %v2366_v26 = vld [vmem:[%s3891_s10 + $0x230] sm:$0xff]  ;;  %v2365_v4 = vld [vmem:[%s3891_s10 + $0x228] sm:$0xff] }
 0x4fa   : > { %v1385_v30 = vadd.f32 %v1383_v29, %v1378_v28  ;;  %v2356_v29 = vld [vmem:[%s3891_s10 + $0x1f8] sm:$0xff] }
 0x4fc   : > { %v3639_v31 = vmax.f32 %v1385_v30, 0.0  ;;  %v2364_v30 = vld [vmem:[%s3891_s10 + $0x220] sm:$0xff] }
 0x4fe   : > { %2279 = vmatmul.msk.f32.vlgmr.msrb.gmra.mxu0 %vm1395_vm2, %v3639_v31  ;;  %2302 = vmatmul.msk.f32.vlgmr.msra.gmra.mxu3 %vm1395_vm2, %v3639_v31 }
 0x506   : > { %2291 = vmatmul.msk.f32.vlgmr.msra.gmra.mxu0 %vm1395_vm2, %v3639_v31 }
 0x57b   : > { %v1416_v33 = vpop.f32.mrf.mxu0 }
 0x57c   : > { %1439 = vmatpush.msrb.mxu2 %v1416_v33  ;;  %v2363_v33 = vld [vmem:[%s3891_s10 + $0x218] sm:$0xff] }
 0x57d   : > { %2280 = vmatmul.msk.f32.vlgmr.msrb.gmra.mxu2 %vm1420_vm3, %v1419_v32  ;;  %v2355_v32 = vld [vmem:[%s3891_s10 + $0x1f0] sm:$0xff] }
 0x57e   : > { %2281 = vmatpush.msk.msra.mxu2 %vm572_vm0, %v3237_v10  ;;  %v2312_v10 = vld [vmem:[%s3891_s10 + $0xf8] sm:$0xff] }
 0x581   : > { %v1548_v35 = vpop.f32.mrf.mxu3 }
 0x582   : > { %1571 = vmatpush.msrb.mxu1 %v1548_v35  ;;  %v2362_v35 = vld [vmem:[%s3891_s10 + $0x210] sm:$0xff] }
 0x583   : > { %v1493_v39 = vpop.f32.mrf.mxu0  ;;  %2304 = vmatmul.msk.f32.vlgmr.msrb.gmra.mxu1 %vm1420_vm3, %v2303_v36  ;;  %v2353_v36 = vld [vmem:[%s3891_s10 + $0x1e0] sm:$0xff] }
 0x584   : > { %1649 = vmatpush.msra.mxu1 %v2323_v34  ;;  %1516 = vmatpush.msrb.mxu2 %v1493_v39  ;;  %v2354_v34 = vld [vmem:[%s3891_s10 + $0x1e8] sm:$0xff]  ;;  %v2360_v39 = vld [vmem:[%s3891_s10 + $0x200] sm:$0xff] }
 0x585   : > { %2282 = vmatmul.msk.f32.vlgmr.msra.gmra.mxu2 %vm568_vm1, %v943_v37  ;;  %v2361_v37 = vld [vmem:[%s3891_s10 + $0x208] sm:$0xff] }
 0x586   : > { %1650 = vmatpush.msra.mxu1 %v2322_v38  ;;  %1594 = vmatpush.msra.mxu2 %v2312_v10  ;;  %v2352_v38 = vld [vmem:[%s3891_s10 + $0x1d8] sm:$0xff]  ;;  %v2351_v10 = vld [vmem:[%s3891_s10 + $0x1d0] sm:$0xff] }
 0x588   : > { %1651 = vmatpush.msra.mxu1 %v2321_v12  ;;  %1595 = vmatpush.msra.mxu2 %v2311_v40  ;;  %v2350_v12 = vld [vmem:[%s3891_s10 + $0x1c8] sm:$0xff]  ;;  %v2349_v40 = vld [vmem:[%s3891_s10 + $0x1c0] sm:$0xff] }
 0x58a   : > { %1652 = vmatpush.msra.mxu1 %v2320_v13  ;;  %1596 = vmatpush.msra.mxu2 %v2310_v41  ;;  %v1907_v13 = vld [vmem:[%s3889_s8] sm:$0xff] }
 0x58b   : > { %1910 = vperm.xlu2 %2419, %v1907_v13  }
 0x58c   : > { %1653 = vmatpush.msra.mxu1 %v2319_v42  ;;  %1597 = vmatpush.msra.mxu2 %v2309_v43 }
 0x58d   : > { %2293 = vmatmul.msk.f32.vlgmr.msrb.gmra.mxu2 %vm1420_vm3, %v2292_v44 }
 0x58e   : > { %1654 = vmatpush.msra.mxu1 %v2318_v45  ;;  %1598 = vmatpush.msra.mxu2 %v2308_v46  ;;  %v2369_v45 = vld [vmem:[%s3888_s7 + $0x40] sm:$0xff] }
 0x590   : > { %1655 = vmatpush.msra.mxu1 %v2317_v47  ;;  %1599 = vmatpush.msra.mxu2 %v2307_v8 }
 0x592   : > { %1656 = vmatpush.msra.mxu1 %v2316_v48  ;;  %1600 = vmatpush.msra.mxu2 %v2306_v49 }
 0x593   : > { %2324 = vmatmul.msk.f32.vlgmr.msra.gmra.mxu1 %vm1395_vm2, %v3639_v31 }
 0x594   : > { %1601 = vmatpush.msra.mxu2 %v2305_v50 }
 0x595   : > { %2313 = vmatmul.msk.f32.vlgmr.msra.gmra.mxu2 %vm1395_vm2, %v3639_v31 }
 0x5e5   : > { %v1911_v50 = vpop.permute.xlu2 %1910 }
 0x600   : > { %v1441_v51 = vpop.f32.mrf.mxu2  ;;  %v1573_v52 = vpop.f32.mrf.mxu1 }
 0x608   : > { %v1464_v53 = vpop.f32.mrf.mxu2 }
 0x609   : > { %v1465_v54 = vadd.f32 %v1464_v53, %v1441_v51 }
 0x610   : > { %v1658_v56 = vpop.f32.mrf.mxu1  ;;  %v1518_v58 = vpop.f32.mrf.mxu2 }
 0x611   : > { %1681 = vmatpush.msrb.mxu3 %v1658_v56  ;;  %v1521_v59 = vadd.f32 %v1518_v58, %v1465_v54 }
 0x612   : > { %2326 = vmatmul.msk.f32.vlgmr.msrb.gmra.mxu3 %vm1420_vm3, %v2325_v57 }
 0x613   : > { %1759 = vmatpush.msra.mxu3 %v2345_v55  ;;  %v1576_v61 = vadd.f32 %v1573_v52, %v1521_v59 }
 0x615   : > { %1760 = vmatpush.msra.mxu3 %v2344_v11 }
 0x617   : > { %1761 = vmatpush.msra.mxu3 %v2343_v60 }
 0x618   : > { %v1603_v2 = vpop.f32.mrf.mxu2 }
 0x619   : > { %1762 = vmatpush.msra.mxu3 %v2342_v63  ;;  %1626 = vmatpush.msrb.mxu0 %v1603_v2 }
 0x61a   : > { %2315 = vmatmul.msk.f32.vlgmr.msrb.gmra.mxu0 %vm1420_vm3, %v2314_v1 }
 0x61b   : > { %1763 = vmatpush.msra.mxu3 %v2341_v0  ;;  %1704 = vmatpush.msra.mxu0 %v2334_v3 }
 0x61d   : > { %1764 = vmatpush.msra.mxu3 %v2340_v5  ;;  %1705 = vmatpush.msra.mxu0 %v2333_v6 }
 0x61f   : > { %1765 = vmatpush.msra.mxu3 %v2339_v7  ;;  %1706 = vmatpush.msra.mxu0 %v2332_v14 }
 0x621   : > { %1766 = vmatpush.msra.mxu3 %v2338_v15  ;;  %1707 = vmatpush.msra.mxu0 %v2331_v16 }
 0x622   : > { %2346 = vmatmul.msk.f32.vlgmr.msra.gmra.mxu3 %vm1395_vm2, %v3639_v31 }
 0x623   : > { %1708 = vmatpush.msra.mxu0 %v2330_v17 }
 0x625   : > { %1709 = vmatpush.msra.mxu0 %v2329_v18 }
 0x627   : > { %1710 = vmatpush.msra.mxu0 %v2328_v62 }
 0x629   : > { %1711 = vmatpush.msra.mxu0 %v2327_v19 }
 0x62a   : > { %2335 = vmatmul.msk.f32.vlgmr.msra.gmra.mxu0 %vm1395_vm2, %v3639_v31 }
 0x695   : > { %v1683_v21 = vpop.f32.mrf.mxu3 }
 0x697   : > { %v1628_v20 = vpop.f32.mrf.mxu0 }
 0x698   : > { %v1631_v22 = vadd.f32 %v1628_v20, %v1576_v61 }
 0x69a   : > { %v1686_v9 = vadd.f32 %v1683_v21, %v1631_v22 }
 0x6a5   : > { %v1768_v24 = vpop.f32.mrf.mxu3 }
 0x6a6   : > { %1791 = vmatpush.msrb.mxu1 %v1768_v24 }
 0x6a7   : > { %2348 = vmatmul.msk.f32.vlgmr.msrb.gmra.mxu1 %vm1420_vm3, %v2347_v25  ;;  %v1713_v28 = vpop.f32.mrf.mxu0 }
 0x6a8   : > { %1869 = vmatpush.msra.mxu1 %v2367_v23  ;;  %1736 = vmatpush.msrb.mxu2 %v1713_v28 }
 0x6a9   : > { %2337 = vmatmul.msk.f32.vlgmr.msrb.gmra.mxu2 %vm1420_vm3, %v2336_v27 }
 0x6aa   : > { %1870 = vmatpush.msra.mxu1 %v2366_v26  ;;  %1814 = vmatpush.msra.mxu2 %v2356_v29 }
 0x6ac   : > { %1871 = vmatpush.msra.mxu1 %v2365_v4  ;;  %1815 = vmatpush.msra.mxu2 %v2355_v32 }
 0x6ae   : > { %1872 = vmatpush.msra.mxu1 %v2364_v30  ;;  %1816 = vmatpush.msra.mxu2 %v2354_v34 }
 0x6b0   : > { %1873 = vmatpush.msra.mxu1 %v2363_v33  ;;  %1817 = vmatpush.msra.mxu2 %v2353_v36 }
 0x6b2   : > { %1874 = vmatpush.msra.mxu1 %v2362_v35  ;;  %1818 = vmatpush.msra.mxu2 %v2352_v38 }
 0x6b4   : > { %1875 = vmatpush.msra.mxu1 %v2361_v37  ;;  %1819 = vmatpush.msra.mxu2 %v2351_v10 }
 0x6b6   : > { %1876 = vmatpush.msra.mxu1 %v2360_v39  ;;  %1820 = vmatpush.msra.mxu2 %v2350_v12 }
 0x6b7   : > { %2368 = vmatmul.msk.f32.vlgmr.msra.gmra.mxu1 %vm1395_vm2, %v3639_v31 }
 0x6b8   : > { %1821 = vmatpush.msra.mxu2 %v2349_v40 }
 0x6b9   : > { %2357 = vmatmul.msk.f32.vlgmr.msra.gmra.mxu2 %vm1395_vm2, %v3639_v31  ;;  %v2358_v31 = vld [vmem:[%s3888_s7 + $0x38] sm:$0xff] }
 0x724   : > { %v1793_v41 = vpop.f32.mrf.mxu1 }
 0x72c   : > { %v1738_v42 = vpop.f32.mrf.mxu2 }
 0x72d   : > { %v1741_v43 = vadd.f32 %v1738_v42, %v1686_v9 }
 0x72f   : > { %v1796_v44 = vadd.f32 %v1793_v41, %v1741_v43 }
 0x734   : > { %v1878_v46 = vpop.f32.mrf.mxu1 }
 0x735   : > { %1901 = vmatpush.msrb.mxu3 %v1878_v46 }
 0x736   : > { %2370 = vmatmul.msk.f32.vlgmr.msrb.gmra.mxu3 %vm1420_vm3, %v2369_v45 }
 0x73c   : > { %v1823_v47 = vpop.f32.mrf.mxu2 }
 0x73d   : > { %1846 = vmatpush.msrb.mxu0 %v1823_v47 }
 0x73e   : > { %2359 = vmatmul.msk.f32.vlgmr.msrb.gmra.mxu0 %vm1420_vm3, %v2358_v31 }
 0x7b9   : > { %v1903_v48 = vpop.f32.mrf.mxu3 }
 0x7bb   : > { %v1848_v8 = vpop.f32.mrf.mxu0 }
 0x7bc   : > { %v1851_v49 = vadd.f32 %v1848_v8, %v1796_v44 }
 0x7be   : > { %v1906_v51 = vadd.f32 %v1903_v48, %v1851_v49 }
 0x7c0   : > { %v1913_v52 = vmul.f32 %v1911_v50, %v1906_v51 }
 0x7c2   : > { %1914 = vst.msk [vmem:[%s379_s16] sm:$0xff] %vm1395_vm2, %v1913_v52 }
 0x7c3   : > { %2447 = shalt.err (!%p2444_p3)
}
 0x7c4   : > { %2376 = dma.vmem_to_hbm [thread:$0]  (%p2584_p5), %s1929_s22, 128, %s1931_s24, %s1916_s14  }
 0x7c5 PF: > { %p2382_p4 = scmp.ge.s32.totalorder %s2482_s20, 2  ;;  %s1942_s1 = sand.u32 1, %s2470_s17  }
 0x7c6   : > { %s1943_s16 = scalar_lea.sflag [#allocation3], %s1942_s1 }
 0x7c7   : > { %p2379_p7 = pnand %p2382_p4, %p2588_p6 }
 0x7c9   : > { %p2380_p8 = pneg %p2379_p7 }
 0x7cb   : > { %2465 = dma.done.wait (%p2380_p8), %s1943_s16, 128  }
 0x7cc   : > { %2467 = vsyncadd (%p2380_p8), %s1943_s16, 4294967168  ;;  %p21_p9 = scmp.ge.s32.totalorder %s2571_s23, 4   ;;  %s3897_s17 = smov %s2474_s18 }
 0x7cd   : > { %s3898_s18 = smov %s2478_s19  ;;  %s3899_s19 = smov %s2582_s26 }
 0x7ce   : > { %s3900_s20 = smov %s2571_s23  ;;  %23 = sbr.rel (!%p21_p9) target bundleno = 5 (0x5), region = 131 }
 0x7d3   :  { %1949 = vsyncpa [#allocation3], 1 }
 0x7d4   :  { %1951 = vsyncpa [#allocation3 + $0x1], 1 }

</bundles_post_ra>
